<compile_context>
chip_gen: v5e
topology: v5e:2x2
jax: 0.10.0
libtpu: 0.0.40
codegen_flags: <defaults>
</compile_context>

<pallas_src>
import functools

import jax
import jax.numpy as jnp
from jax.experimental import pallas as pl
from jax.experimental.pallas import tpu as pltpu


# ---------------------------------------------------------------------------
# helpers
# ---------------------------------------------------------------------------
def _vmem_limit_bytes(block_nbytes, scratch_nbytes=0):
    """Scoped-VMEM budget: double-buffered blocks + scratch + headroom,
    clamped well under v7x's 64 MiB physical VMEM."""
    est = 2 * int(sum(block_nbytes)) + int(scratch_nbytes)   # double-buffering
    est = 2 * est + (1 << 20)                                 # headroom
    return int(min(max(est, 8 << 20), 32 << 20))


def _pick_time_chunk(seq_len, requested=None, cap=4):
    """Largest divisor of seq_len <= cap. Modest chunks bound VMEM and give the
    pipeline something to overlap; the inner unroll stays small."""
    if requested is not None:
        if seq_len % requested != 0:
            raise ValueError("time_chunk must divide seq_len")
        return requested
    tc = 1
    for d in range(1, min(seq_len, cap) + 1):
        if seq_len % d == 0:
            tc = d
    return tc


# ---------------------------------------------------------------------------
# Kernel 1: hoisted input projection  gx = sum_p x_p @ Wih_p + bias
# ---------------------------------------------------------------------------
def _proj_kernel(*refs, n_parts):
    x_refs = refs[:n_parts]
    w_refs = refs[n_parts:2 * n_parts]
    b_ref = refs[2 * n_parts]
    gx_ref = refs[2 * n_parts + 1]

    acc = jnp.dot(x_refs[0][...].astype(jnp.bfloat16), w_refs[0][...],
                  preferred_element_type=jnp.float32)
    for p in range(1, n_parts):
        acc = acc + jnp.dot(x_refs[p][...].astype(jnp.bfloat16), w_refs[p][...],
                            preferred_element_type=jnp.float32)
    gx_ref[...] = acc + b_ref[...]


def input_projection(x_parts, w_parts, bias, *, seq_len, batch_p, time_chunk):
    n = len(x_parts)
    total_rows = x_parts[0].shape[0]
    g8 = w_parts[0].shape[1]
    n_chunks = seq_len // time_chunk
    rows = time_chunk * batch_p

    in_specs = [pl.BlockSpec((rows, xp.shape[1]), lambda i: (i, 0))
                for xp in x_parts]
    in_specs += [pl.BlockSpec(wp.shape, lambda i: (0, 0)) for wp in w_parts]
    in_specs += [pl.BlockSpec(bias.shape, lambda i: (0, 0))]
    out_spec = pl.BlockSpec((rows, g8), lambda i: (i, 0))

    blk = ([rows * xp.shape[1] * 4 for xp in x_parts]
           + [wp.size * wp.dtype.itemsize for wp in w_parts]
           + [bias.size * 4, rows * g8 * 4])

    return pl.pallas_call(
        functools.partial(_proj_kernel, n_parts=n),
        out_shape=jax.ShapeDtypeStruct((total_rows, g8), jnp.float32),
        grid=(n_chunks,),
        in_specs=in_specs,
        out_specs=out_spec,
        compiler_params=pltpu.CompilerParams(
            dimension_semantics=("parallel",),
            vmem_limit_bytes=_vmem_limit_bytes(blk)),
    )(*x_parts, *w_parts, bias)


# ---------------------------------------------------------------------------
# Kernel 2: fused bidirectional recurrence (optionally fused with final FC)
# ---------------------------------------------------------------------------
def _recurrence_kernel(*refs, time_chunk, fuse_fc):
    if fuse_fc:
        (gxf_ref, gxb_ref, whh_ref, wfcf_ref, wfcb_ref, bfc_ref,
         logits_ref, h_scr, c_scr) = refs
    else:
        (gxf_ref, gxb_ref, whh_ref, outf_ref, outb_ref, h_scr, c_scr) = refs

    chunk = pl.program_id(0)
    n_chunks = pl.num_programs(0)
    batch_p, h2 = h_scr.shape            # h2 = 2 * hidden  ([fwd | bwd] lanes)
    hidden = h2 // 2
    g8 = 4 * h2                          # gate-major width: [i|f|g|o] x 2H

    # h0 = c0 = 0 (matches torch.zeros(...) in the reference forward()).
    @pl.when(chunk == 0)
    def _():
        h_scr[...] = jnp.zeros_like(h_scr)
        c_scr[...] = jnp.zeros_like(c_scr)

    # Hoisted loop invariants.
    whh = whh_ref[...]                                           # (2H, 8H)
    col = jax.lax.broadcasted_iota(jnp.int32, (batch_p, g8), 1)
    fwd_lane = (col % h2) < hidden       # fwd half of every 2H gate block

    # Loop-carried vreg state inside the chunk (no per-step VMEM round trips).
    h = h_scr[...]
    c = c_scr[...]

    h_bwd_first = None                   # h_bwd at global time T-1 (chunk 0, j 0)
    h_fwd_last = None                    # h_fwd at global time T-1 (last chunk, last j)
    for j in range(time_chunk):          # small static unroll
        rf = j * batch_p                               # fwd time row in this block
        rb = (time_chunk - 1 - j) * batch_p            # bwd time row in this block

        # One fused recurrent matmul for both directions.
        hh = jnp.dot(h, whh, preferred_element_type=jnp.float32)  # (Bp, 8H)
        # Merge fwd-time / bwd-time input projections with one lane select.
        gx = jnp.where(fwd_lane, gxf_ref[rf:rf + batch_p, :],
                       gxb_ref[rb:rb + batch_p, :])
        gates = gx + hh

        # Gate-major layout: full (Bp, 2H) vectors, no per-direction concat.
        i_g = jax.nn.sigmoid(gates[:, 0 * h2:1 * h2])
        f_g = jax.nn.sigmoid(gates[:, 1 * h2:2 * h2])
        g_g = jnp.tanh(gates[:, 2 * h2:3 * h2])
        o_g = jax.nn.sigmoid(gates[:, 3 * h2:4 * h2])
        c = f_g * c + i_g * g_g
        h = o_g * jnp.tanh(c)

        if not fuse_fc:
            outf_ref[rf:rf + batch_p, :] = h[:, :hidden]
            outb_ref[rb:rb + batch_p, :] = h[:, hidden:]
        if j == 0:
            h_bwd_first = h[:, hidden:]
        if j == time_chunk - 1:
            h_fwd_last = h[:, :hidden]

    # Persist state for the next chunk.
    h_scr[...] = h
    c_scr[...] = c

    if fuse_fc:
        # fc(out[:, -1, :]) = h_fwd(T-1) @ Wfc_f + h_bwd(T-1) @ Wfc_b + b.
        # h_bwd(T-1) is produced at grid step 0; h_fwd(T-1) at the last step.
        @pl.when(chunk == 0)
        def _():
            logits_ref[...] = (
                jnp.dot(h_bwd_first, wfcb_ref[...],
                        preferred_element_type=jnp.float32) + bfc_ref[...])

        @pl.when(chunk == n_chunks - 1)
        def _():
            logits_ref[...] = logits_ref[...] + jnp.dot(
                h_fwd_last, wfcf_ref[...], preferred_element_type=jnp.float32)


def bilstm_recurrence(gx, whh, *, seq_len, batch_p, time_chunk, fc=None):
    total_rows, g8 = gx.shape
    hidden = g8 // 8
    n_chunks = seq_len // time_chunk
    rows = time_chunk * batch_p

    gx_fwd_spec = pl.BlockSpec((rows, g8), lambda i: (i, 0))
    gx_bwd_spec = pl.BlockSpec((rows, g8), lambda i, n=n_chunks: (n - 1 - i, 0))
    whh_spec = pl.BlockSpec(whh.shape, lambda i: (0, 0))
    scratch = [pltpu.VMEM((batch_p, 2 * hidden), jnp.float32),   # [h_f | h_b]
               pltpu.VMEM((batch_p, 2 * hidden), jnp.float32)]   # [c_f | c_b]
    scratch_bytes = 2 * batch_p * 2 * hidden * 4

    kernel = functools.partial(_recurrence_kernel, time_chunk=time_chunk,
                               fuse_fc=fc is not None)

    if fc is None:
        blk = [rows * g8 * 4] * 2 + [whh.size * 4] + [rows * hidden * 4] * 2
        return pl.pallas_call(
            kernel,
            out_shape=(jax.ShapeDtypeStruct((total_rows, hidden), jnp.float32),
                       jax.ShapeDtypeStruct((total_rows, hidden), jnp.float32)),
            grid=(n_chunks,),
            in_specs=[gx_fwd_spec, gx_bwd_spec, whh_spec],
            out_specs=(pl.BlockSpec((rows, hidden), lambda i: (i, 0)),
                       pl.BlockSpec((rows, hidden),
                                    lambda i, n=n_chunks: (n - 1 - i, 0))),
            scratch_shapes=scratch,
            compiler_params=pltpu.CompilerParams(
                dimension_semantics=("arbitrary",),
                vmem_limit_bytes=_vmem_limit_bytes(blk, scratch_bytes)),
        )(gx, gx, whh)

    wfc_f, wfc_b, b_fc = fc
    num_classes = wfc_f.shape[1]
    blk = ([rows * g8 * 4] * 2
           + [whh.size * 4, wfc_f.size * 4, wfc_b.size * 4, b_fc.size * 4,
              batch_p * num_classes * 4])
    return pl.pallas_call(
        kernel,
        out_shape=jax.ShapeDtypeStruct((batch_p, num_classes), jnp.float32),
        grid=(n_chunks,),
        in_specs=[gx_fwd_spec, gx_bwd_spec, whh_spec,
                  pl.BlockSpec(wfc_f.shape, lambda i: (0, 0)),
                  pl.BlockSpec(wfc_b.shape, lambda i: (0, 0)),
                  pl.BlockSpec(b_fc.shape, lambda i: (0, 0))],
        out_specs=pl.BlockSpec((batch_p, num_classes), lambda i: (0, 0)),
        scratch_shapes=scratch,
        compiler_params=pltpu.CompilerParams(
            dimension_semantics=("arbitrary",),
            vmem_limit_bytes=_vmem_limit_bytes(blk, scratch_bytes)),
    )(gx, gx, whh, wfc_f, wfc_b, b_fc)


# ---------------------------------------------------------------------------
# Parameter construction (deterministic, PyTorch-like uniform init) + packing
# ---------------------------------------------------------------------------
def init_params(key, input_size, hidden_size, num_layers, num_classes):
    H = hidden_size
    bound = 1.0 / float(H) ** 0.5

    def unif(k, shape):
        return jax.random.uniform(k, shape, jnp.float32, -bound, bound)

    def pack_gate_major(mat_f, mat_b):
        # mat_*: (4H, K) PyTorch layout, gate row order i,f,g,o.
        # -> (K, 8H), columns gate-major: [i_f|i_b | f_f|f_b | g_f|g_b | o_f|o_b]
        cols = []
        for g in range(4):
            cols.append(mat_f[g * H:(g + 1) * H, :].T)
            cols.append(mat_b[g * H:(g + 1) * H, :].T)
        return jnp.concatenate(cols, axis=1)

    layers = []
    for layer in range(num_layers):
        din = input_size if layer == 0 else 2 * H
        key, kf1, kf2, kf3, kf4, kb1, kb2, kb3, kb4 = jax.random.split(key, 9)
        w_ih_f = unif(kf1, (4 * H, din))
        w_hh_f = unif(kf2, (4 * H, H))
        b_f = unif(kf3, (4 * H,)) + unif(kf4, (4 * H,))     # b_ih + b_hh
        w_ih_b = unif(kb1, (4 * H, din))
        w_hh_b = unif(kb2, (4 * H, H))
        b_b = unif(kb3, (4 * H,)) + unif(kb4, (4 * H,))

        wih = pack_gate_major(w_ih_f, w_ih_b)               # (din, 8H)
        zeros4h = jnp.zeros((4 * H, H), jnp.float32)
        whh = jnp.concatenate(                               # (2H, 8H)
            [pack_gate_major(w_hh_f, zeros4h),               # rows 0:H  <- h_f
             pack_gate_major(zeros4h, w_hh_b)], axis=0)      # rows H:2H <- h_b
        b_cols = []
        for g in range(4):
            b_cols.append(b_f[g * H:(g + 1) * H])
            b_cols.append(b_b[g * H:(g + 1) * H])
        b = jnp.concatenate(b_cols).reshape(1, 8 * H)

        if layer == 0:
            wih_parts = (wih.astype(jnp.bfloat16),)
        else:
            # Rows 0:H multiply the previous layer's fwd output, H:2H the bwd
            # output -> projection consumes the two halves without a concat.
            wih_parts = (wih[:H].astype(jnp.bfloat16),
                         wih[H:].astype(jnp.bfloat16))
        layers.append({"wih_parts": wih_parts, "whh": whh, "b": b})

    key, k1, k2 = jax.random.split(key, 3)
    fc_bound = 1.0 / float(2 * H) ** 0.5
    w_fc = jax.random.uniform(k1, (num_classes, 2 * H), jnp.float32,
                              -fc_bound, fc_bound)
    b_fc = jax.random.uniform(k2, (num_classes,), jnp.float32,
                              -fc_bound, fc_bound)
    fc = {"wf_t": jnp.transpose(w_fc[:, :H]),      # (H, C): fwd contribution
          "wb_t": jnp.transpose(w_fc[:, H:]),      # (H, C): bwd contribution
          "b": b_fc.reshape(1, num_classes)}
    return {"layers": layers, "fc": fc}


# ---------------------------------------------------------------------------
# Full forward pass
# ---------------------------------------------------------------------------
@functools.partial(jax.jit, static_argnames=("num_layers", "time_chunk"))
def bilstm_forward(x, params, *, num_layers, time_chunk=None):
    B, T, Din = x.shape
    Bp = -(-B // 8) * 8   # pad batch to a sublane multiple -> aligned row blocks
    xp = jnp.zeros((Bp, T, Din), jnp.float32).at[:B].set(x.astype(jnp.float32))
    # Time-major, flattened to 2-D: row t*Bp + b  <->  (time t, batch b).
    x2d = jnp.transpose(xp, (1, 0, 2)).reshape(T * Bp, Din)

    tc = _pick_time_chunk(T, time_chunk)

    parts = (x2d,)
    logits = None
    for layer_idx in range(num_layers):
        p = params["layers"][layer_idx]
        gx = input_projection(parts, p["wih_parts"], p["b"],
                              seq_len=T, batch_p=Bp, time_chunk=tc)
        if layer_idx == num_layers - 1:
            logits = bilstm_recurrence(
                gx, p["whh"], seq_len=T, batch_p=Bp, time_chunk=tc,
                fc=(params["fc"]["wf_t"], params["fc"]["wb_t"],
                    params["fc"]["b"]))
        else:
            parts = bilstm_recurrence(gx, p["whh"], seq_len=T, batch_p=Bp,
                                      time_chunk=tc)
    return logits[:B]


# ---------------------------------------------------------------------------
if __name__ == "__main__":
    INPUT_SIZE = 16
    HIDDEN_SIZE = 32
    NUM_LAYERS = 2
    NUM_CLASSES = 5
    BATCH = 4
    SEQ = 8

    key = jax.random.PRNGKey(0)
    key, xk = jax.random.split(key)
    x = jax.random.normal(xk, (BATCH, SEQ, INPUT_SIZE), jnp.float32)

    params = init_params(key, INPUT_SIZE, HIDDEN_SIZE, NUM_LAYERS, NUM_CLASSES)

    out = bilstm_forward(x, params, num_layers=NUM_LAYERS)
    jax.block_until_ready(out)
    assert out.shape == (BATCH, NUM_CLASSES)
    print("KERNEL_OK")
</pallas_src>

<mosaic_0001>
module attributes {stable_mosaic.version = 11 : i64} {
  func.func @_proj_kernel(%arg0: i32, %arg1: memref<32x16xf32, #tpu.memory_space<vmem>>, %arg2: memref<16x256xbf16, #tpu.memory_space<vmem>>, %arg3: memref<1x256xf32, #tpu.memory_space<vmem>>, %arg4: memref<32x256xf32, #tpu.memory_space<vmem>>) attributes {dimension_semantics = [#tpu.dimension_semantics<parallel>], iteration_bounds = array<i64: 2>, scalar_prefetch = 0 : i64, scratch_operands = 0 : i64, tpu.core_type = #tpu.core_type<tc>, window_params = [{transform_indices = @transform_0, window_bounds = array<i64: 32, 16>}, {pipeline_mode = #tpu.pipeline_mode<synchronous>, transform_indices = @transform_1, window_bounds = array<i64: 16, 256>}, {pipeline_mode = #tpu.pipeline_mode<synchronous>, transform_indices = @transform_2, window_bounds = array<i64: 1, 256>}, {transform_indices = @transform_3, window_bounds = array<i64: 32, 256>}]} {
    %c0 = arith.constant 0 : index
    %c0_0 = arith.constant 0 : index
    %0 = vector.load %arg1[%c0, %c0_0] : memref<32x16xf32, #tpu.memory_space<vmem>>, vector<32x16xf32>
    %1 = arith.truncf %0 : vector<32x16xf32> to vector<32x16xbf16>
    %c0_1 = arith.constant 0 : index
    %c0_2 = arith.constant 0 : index
    %2 = vector.load %arg2[%c0_1, %c0_2] : memref<16x256xbf16, #tpu.memory_space<vmem>>, vector<16x256xbf16>
    %cst = arith.constant dense<0.000000e+00> : vector<32x256xf32>
    %3 = tpu.matmul %1, %2, %cst {dimension_numbers = #tpu.dot_dimension_numbers<[1], [0], [0], [1], [0, 0, 1, 1], [], []>} : vector<32x16xbf16>, vector<16x256xbf16>, vector<32x256xf32> -> vector<32x256xf32>
    %c0_3 = arith.constant 0 : index
    %c0_4 = arith.constant 0 : index
    %4 = vector.load %arg3[%c0_3, %c0_4] : memref<1x256xf32, #tpu.memory_space<vmem>>, vector<1x256xf32>
    %5 = vector.broadcast %4 : vector<1x256xf32> to vector<32x256xf32>
    %6 = arith.addf %3, %5 : vector<32x256xf32>
    %c0_5 = arith.constant 0 : index
    %c0_6 = arith.constant 0 : index
    %7 = vector.load %arg4[%c0_5, %c0_6] : memref<32x256xf32, #tpu.memory_space<vmem>>, vector<32x256xf32>
    tpu.vector_store %arg4[%c0_5, %c0_6], %6 {strides = array<i32>} : memref<32x256xf32, #tpu.memory_space<vmem>>, vector<32x256xf32>,
    return
  }
  func.func @transform_0(%arg0: i32) -> (i32, i32) {
    %c0_i32 = arith.constant 0 : i32
    %c0_i32_0 = arith.constant 0 : i32
    return %arg0, %c0_i32 : i32, i32
  }
  func.func @transform_1(%arg0: i32) -> (i32, i32) {
    %c0_i32 = arith.constant 0 : i32
    %c0_i32_0 = arith.constant 0 : i32
    %c0_i32_1 = arith.constant 0 : i32
    return %c0_i32, %c0_i32_0 : i32, i32
  }
  func.func @transform_2(%arg0: i32) -> (i32, i32) {
    %c0_i32 = arith.constant 0 : i32
    %c0_i32_0 = arith.constant 0 : i32
    %c0_i32_1 = arith.constant 0 : i32
    return %c0_i32, %c0_i32_0 : i32, i32
  }
  func.func @transform_3(%arg0: i32) -> (i32, i32) {
    %c0_i32 = arith.constant 0 : i32
    %c0_i32_0 = arith.constant 0 : i32
    return %arg0, %c0_i32 : i32, i32
  }
}

module attributes {stable_mosaic.version = 11 : i64} {
  func.func @_recurrence_kernel(%arg0: i32, %arg1: memref<32x256xf32, #tpu.memory_space<vmem>>, %arg2: memref<32x256xf32, #tpu.memory_space<vmem>>, %arg3: memref<64x256xf32, #tpu.memory_space<vmem>>, %arg4: memref<32x32xf32, #tpu.memory_space<vmem>>, %arg5: memref<32x32xf32, #tpu.memory_space<vmem>>, %arg6: memref<8x64xf32, #tpu.memory_space<vmem>>, %arg7: memref<8x64xf32, #tpu.memory_space<vmem>>) attributes {dimension_semantics = [#tpu.dimension_semantics<arbitrary>], iteration_bounds = array<i64: 2>, scalar_prefetch = 0 : i64, scratch_operands = 2 : i64, tpu.core_type = #tpu.core_type<tc>, window_params = [{transform_indices = @transform_0, window_bounds = array<i64: 32, 256>}, {transform_indices = @transform_1, window_bounds = array<i64: 32, 256>}, {pipeline_mode = #tpu.pipeline_mode<synchronous>, transform_indices = @transform_2, window_bounds = array<i64: 64, 256>}, {transform_indices = @transform_3, window_bounds = array<i64: 32, 32>}, {transform_indices = @transform_4, window_bounds = array<i64: 32, 32>}]} {
    %c0_i32 = arith.constant 0 : i32
    %0 = arith.cmpi eq, %arg0, %c0_i32 : i32
    %1 = arith.extui %0 : i1 to i32
    %c0_i32_0 = arith.constant 0 : i32
    %2 = arith.cmpi ne, %1, %c0_i32_0 : i32
    scf.if %2 {
      %cst_58 = arith.constant 0.000000e+00 : f32
      %163 = vector.broadcast %cst_58 : f32 to vector<8x64xf32>
      %c0_59 = arith.constant 0 : index
      %c0_60 = arith.constant 0 : index
      %164 = vector.load %arg6[%c0_59, %c0_60] : memref<8x64xf32, #tpu.memory_space<vmem>>, vector<8x64xf32>
      tpu.vector_store %arg6[%c0_59, %c0_60], %163 {strides = array<i32>} : memref<8x64xf32, #tpu.memory_space<vmem>>, vector<8x64xf32>,
      %cst_61 = arith.constant 0.000000e+00 : f32
      %165 = vector.broadcast %cst_61 : f32 to vector<8x64xf32>
      %c0_62 = arith.constant 0 : index
      %c0_63 = arith.constant 0 : index
      %166 = vector.load %arg7[%c0_62, %c0_63] : memref<8x64xf32, #tpu.memory_space<vmem>>, vector<8x64xf32>
      tpu.vector_store %arg7[%c0_62, %c0_63], %165 {strides = array<i32>} : memref<8x64xf32, #tpu.memory_space<vmem>>, vector<8x64xf32>,
    } else {
    }
    %c0 = arith.constant 0 : index
    %c0_1 = arith.constant 0 : index
    %3 = vector.load %arg3[%c0, %c0_1] : memref<64x256xf32, #tpu.memory_space<vmem>>, vector<64x256xf32>
    %4 = tpu.iota {dimensions = array<i32: 1>} : vector<8x256xi32>
    %c64_i32 = arith.constant 64 : i32
    %c0_i32_2 = arith.constant 0 : i32
    %5 = arith.cmpi eq, %c64_i32, %c0_i32_2 : i32
    %c1_i32 = arith.constant 1 : i32
    %6 = arith.select %5, %c1_i32, %c64_i32 : i32
    %7 = vector.broadcast %6 : i32 to vector<8x256xi32>
    %8 = arith.remsi %4, %7 : vector<8x256xi32>
    %c0_i32_3 = arith.constant 0 : i32
    %9 = vector.broadcast %c0_i32_3 : i32 to vector<8x256xi32>
    %10 = arith.cmpi ne, %8, %9 : vector<8x256xi32>
    %c0_i32_4 = arith.constant 0 : i32
    %11 = vector.broadcast %c0_i32_4 : i32 to vector<8x256xi32>
    %12 = arith.cmpi slt, %8, %11 : vector<8x256xi32>
    %c0_i32_5 = arith.constant 0 : i32
    %13 = arith.cmpi slt, %6, %c0_i32_5 : i32
    %14 = vector.broadcast %13 : i1 to vector<8x256xi1>
    %15 = vector.broadcast %14 : vector<8x256xi1> to vector<8x256xi1>
    %16 = arith.xori %12, %15 : vector<8x256xi1>
    %17 = arith.andi %16, %10 : vector<8x256xi1>
    %18 = vector.broadcast %6 : i32 to vector<8x256xi32>
    %19 = arith.addi %8, %18 : vector<8x256xi32>
    %20 = arith.select %17, %19, %8 : vector<8x256xi1>, vector<8x256xi32>
    %c32_i32 = arith.constant 32 : i32
    %21 = vector.broadcast %c32_i32 : i32 to vector<8x256xi32>
    %22 = arith.cmpi slt, %20, %21 : vector<8x256xi32>
    %c0_6 = arith.constant 0 : index
    %c0_7 = arith.constant 0 : index
    %23 = vector.load %arg6[%c0_6, %c0_7] : memref<8x64xf32, #tpu.memory_space<vmem>>, vector<8x64xf32>
    %c0_8 = arith.constant 0 : index
    %c0_9 = arith.constant 0 : index
    %24 = vector.load %arg7[%c0_8, %c0_9] : memref<8x64xf32, #tpu.memory_space<vmem>>, vector<8x64xf32>
    %cst = arith.constant dense<0.000000e+00> : vector<8x256xf32>
    %25 = tpu.matmul %23, %3, %cst {dimension_numbers = #tpu.dot_dimension_numbers<[1], [0], [0], [1], [0, 0, 1, 1], [], []>} : vector<8x64xf32>, vector<64x256xf32>, vector<8x256xf32> -> vector<8x256xf32>
    %c0_10 = arith.constant 0 : index
    %c0_11 = arith.constant 0 : index
    %26 = vector.load %arg1[%c0_10, %c0_11] : memref<32x256xf32, #tpu.memory_space<vmem>>, vector<8x256xf32>
    %c24 = arith.constant 24 : index
    %c0_12 = arith.constant 0 : index
    %27 = vector.load %arg2[%c24, %c0_12] : memref<32x256xf32, #tpu.memory_space<vmem>>, vector<8x256xf32>
    %28 = arith.select %22, %26, %27 : vector<8x256xi1>, vector<8x256xf32>
    %29 = arith.addf %28, %25 : vector<8x256xf32>
    %30 = vector.extract_strided_slice %29 {offsets = [0, 0], sizes = [8, 64], strides = [1, 1]} : vector<8x256xf32> to vector<8x64xf32>
    %31 = arith.negf %30 : vector<8x64xf32>
    %32 = math.exp %31 : vector<8x64xf32>
    %cst_13 = arith.constant 1.000000e+00 : f32
    %33 = vector.broadcast %cst_13 : f32 to vector<8x64xf32>
    %34 = arith.addf %33, %32 : vector<8x64xf32>
    %35 = arith.divf %33, %34 : vector<8x64xf32>
    %36 = vector.extract_strided_slice %29 {offsets = [0, 64], sizes = [8, 64], strides = [1, 1]} : vector<8x256xf32> to vector<8x64xf32>
    %37 = arith.negf %36 : vector<8x64xf32>
    %38 = math.exp %37 : vector<8x64xf32>
    %cst_14 = arith.constant 1.000000e+00 : f32
    %39 = vector.broadcast %cst_14 : f32 to vector<8x64xf32>
    %40 = arith.addf %39, %38 : vector<8x64xf32>
    %41 = arith.divf %39, %40 : vector<8x64xf32>
    %42 = vector.extract_strided_slice %29 {offsets = [0, 128], sizes = [8, 64], strides = [1, 1]} : vector<8x256xf32> to vector<8x64xf32>
    %43 = math.tanh %42 : vector<8x64xf32>
    %44 = vector.extract_strided_slice %29 {offsets = [0, 192], sizes = [8, 64], strides = [1, 1]} : vector<8x256xf32> to vector<8x64xf32>
    %45 = arith.negf %44 : vector<8x64xf32>
    %46 = math.exp %45 : vector<8x64xf32>
    %cst_15 = arith.constant 1.000000e+00 : f32
    %47 = vector.broadcast %cst_15 : f32 to vector<8x64xf32>
    %48 = arith.addf %47, %46 : vector<8x64xf32>
    %49 = arith.divf %47, %48 : vector<8x64xf32>
    %50 = arith.mulf %41, %24 : vector<8x64xf32>
    %51 = arith.mulf %35, %43 : vector<8x64xf32>
    %52 = arith.addf %50, %51 : vector<8x64xf32>
    %53 = math.tanh %52 : vector<8x64xf32>
    %54 = arith.mulf %49, %53 : vector<8x64xf32>
    %55 = vector.extract_strided_slice %54 {offsets = [0, 0], sizes = [8, 32], strides = [1, 1]} : vector<8x64xf32> to vector<8x32xf32>
    %c0_16 = arith.constant 0 : index
    %c0_17 = arith.constant 0 : index
    %56 = vector.load %arg4[%c0_16, %c0_17] : memref<32x32xf32, #tpu.memory_space<vmem>>, vector<8x32xf32>
    tpu.vector_store %arg4[%c0_16, %c0_17], %55 {strides = array<i32>} : memref<32x32xf32, #tpu.memory_space<vmem>>, vector<8x32xf32>,
    %57 = vector.extract_strided_slice %54 {offsets = [0, 32], sizes = [8, 32], strides = [1, 1]} : vector<8x64xf32> to vector<8x32xf32>
    %c24_18 = arith.constant 24 : index
    %c0_19 = arith.constant 0 : index
    %58 = vector.load %arg5[%c24_18, %c0_19] : memref<32x32xf32, #tpu.memory_space<vmem>>, vector<8x32xf32>
    tpu.vector_store %arg5[%c24_18, %c0_19], %57 {strides = array<i32>} : memref<32x32xf32, #tpu.memory_space<vmem>>, vector<8x32xf32>,
    %cst_20 = arith.constant dense<0.000000e+00> : vector<8x256xf32>
    %59 = tpu.matmul %54, %3, %cst_20 {dimension_numbers = #tpu.dot_dimension_numbers<[1], [0], [0], [1], [0, 0, 1, 1], [], []>} : vector<8x64xf32>, vector<64x256xf32>, vector<8x256xf32> -> vector<8x256xf32>
    %c8 = arith.constant 8 : index
    %c0_21 = arith.constant 0 : index
    %60 = vector.load %arg1[%c8, %c0_21] : memref<32x256xf32, #tpu.memory_space<vmem>>, vector<8x256xf32>
    %c16 = arith.constant 16 : index
    %c0_22 = arith.constant 0 : index
    %61 = vector.load %arg2[%c16, %c0_22] : memref<32x256xf32, #tpu.memory_space<vmem>>, vector<8x256xf32>
    %62 = arith.select %22, %60, %61 : vector<8x256xi1>, vector<8x256xf32>
    %63 = arith.addf %62, %59 : vector<8x256xf32>
    %64 = vector.extract_strided_slice %63 {offsets = [0, 0], sizes = [8, 64], strides = [1, 1]} : vector<8x256xf32> to vector<8x64xf32>
    %65 = arith.negf %64 : vector<8x64xf32>
    %66 = math.exp %65 : vector<8x64xf32>
    %cst_23 = arith.constant 1.000000e+00 : f32
    %67 = vector.broadcast %cst_23 : f32 to vector<8x64xf32>
    %68 = arith.addf %67, %66 : vector<8x64xf32>
    %69 = arith.divf %67, %68 : vector<8x64xf32>
    %70 = vector.extract_strided_slice %63 {offsets = [0, 64], sizes = [8, 64], strides = [1, 1]} : vector<8x256xf32> to vector<8x64xf32>
    %71 = arith.negf %70 : vector<8x64xf32>
    %72 = math.exp %71 : vector<8x64xf32>
    %cst_24 = arith.constant 1.000000e+00 : f32
    %73 = vector.broadcast %cst_24 : f32 to vector<8x64xf32>
    %74 = arith.addf %73, %72 : vector<8x64xf32>
    %75 = arith.divf %73, %74 : vector<8x64xf32>
    %76 = vector.extract_strided_slice %63 {offsets = [0, 128], sizes = [8, 64], strides = [1, 1]} : vector<8x256xf32> to vector<8x64xf32>
    %77 = math.tanh %76 : vector<8x64xf32>
    %78 = vector.extract_strided_slice %63 {offsets = [0, 192], sizes = [8, 64], strides = [1, 1]} : vector<8x256xf32> to vector<8x64xf32>
    %79 = arith.negf %78 : vector<8x64xf32>
    %80 = math.exp %79 : vector<8x64xf32>
    %cst_25 = arith.constant 1.000000e+00 : f32
    %81 = vector.broadcast %cst_25 : f32 to vector<8x64xf32>
    %82 = arith.addf %81, %80 : vector<8x64xf32>
    %83 = arith.divf %81, %82 : vector<8x64xf32>
    %84 = arith.mulf %75, %52 : vector<8x64xf32>
    %85 = arith.mulf %69, %77 : vector<8x64xf32>
    %86 = arith.addf %84, %85 : vector<8x64xf32>
    %87 = math.tanh %86 : vector<8x64xf32>
    %88 = arith.mulf %83, %87 : vector<8x64xf32>
    %89 = vector.extract_strided_slice %88 {offsets = [0, 0], sizes = [8, 32], strides = [1, 1]} : vector<8x64xf32> to vector<8x32xf32>
    %c8_26 = arith.constant 8 : index
    %c0_27 = arith.constant 0 : index
    %90 = vector.load %arg4[%c8_26, %c0_27] : memref<32x32xf32, #tpu.memory_space<vmem>>, vector<8x32xf32>
    tpu.vector_store %arg4[%c8_26, %c0_27], %89 {strides = array<i32>} : memref<32x32xf32, #tpu.memory_space<vmem>>, vector<8x32xf32>,
    %91 = vector.extract_strided_slice %88 {offsets = [0, 32], sizes = [8, 32], strides = [1, 1]} : vector<8x64xf32> to vector<8x32xf32>
    %c16_28 = arith.constant 16 : index
    %c0_29 = arith.constant 0 : index
    %92 = vector.load %arg5[%c16_28, %c0_29] : memref<32x32xf32, #tpu.memory_space<vmem>>, vector<8x32xf32>
    tpu.vector_store %arg5[%c16_28, %c0_29], %91 {strides = array<i32>} : memref<32x32xf32, #tpu.memory_space<vmem>>, vector<8x32xf32>,
    %cst_30 = arith.constant dense<0.000000e+00> : vector<8x256xf32>
    %93 = tpu.matmul %88, %3, %cst_30 {dimension_numbers = #tpu.dot_dimension_numbers<[1], [0], [0], [1], [0, 0, 1, 1], [], []>} : vector<8x64xf32>, vector<64x256xf32>, vector<8x256xf32> -> vector<8x256xf32>
    %c16_31 = arith.constant 16 : index
    %c0_32 = arith.constant 0 : index
    %94 = vector.load %arg1[%c16_31, %c0_32] : memref<32x256xf32, #tpu.memory_space<vmem>>, vector<8x256xf32>
    %c8_33 = arith.constant 8 : index
    %c0_34 = arith.constant 0 : index
    %95 = vector.load %arg2[%c8_33, %c0_34] : memref<32x256xf32, #tpu.memory_space<vmem>>, vector<8x256xf32>
    %96 = arith.select %22, %94, %95 : vector<8x256xi1>, vector<8x256xf32>
    %97 = arith.addf %96, %93 : vector<8x256xf32>
    %98 = vector.extract_strided_slice %97 {offsets = [0, 0], sizes = [8, 64], strides = [1, 1]} : vector<8x256xf32> to vector<8x64xf32>
    %99 = arith.negf %98 : vector<8x64xf32>
    %100 = math.exp %99 : vector<8x64xf32>
    %cst_35 = arith.constant 1.000000e+00 : f32
    %101 = vector.broadcast %cst_35 : f32 to vector<8x64xf32>
    %102 = arith.addf %101, %100 : vector<8x64xf32>
    %103 = arith.divf %101, %102 : vector<8x64xf32>
    %104 = vector.extract_strided_slice %97 {offsets = [0, 64], sizes = [8, 64], strides = [1, 1]} : vector<8x256xf32> to vector<8x64xf32>
    %105 = arith.negf %104 : vector<8x64xf32>
    %106 = math.exp %105 : vector<8x64xf32>
    %cst_36 = arith.constant 1.000000e+00 : f32
    %107 = vector.broadcast %cst_36 : f32 to vector<8x64xf32>
    %108 = arith.addf %107, %106 : vector<8x64xf32>
    %109 = arith.divf %107, %108 : vector<8x64xf32>
    %110 = vector.extract_strided_slice %97 {offsets = [0, 128], sizes = [8, 64], strides = [1, 1]} : vector<8x256xf32> to vector<8x64xf32>
    %111 = math.tanh %110 : vector<8x64xf32>
    %112 = vector.extract_strided_slice %97 {offsets = [0, 192], sizes = [8, 64], strides = [1, 1]} : vector<8x256xf32> to vector<8x64xf32>
    %113 = arith.negf %112 : vector<8x64xf32>
    %114 = math.exp %113 : vector<8x64xf32>
    %cst_37 = arith.constant 1.000000e+00 : f32
    %115 = vector.broadcast %cst_37 : f32 to vector<8x64xf32>
    %116 = arith.addf %115, %114 : vector<8x64xf32>
    %117 = arith.divf %115, %116 : vector<8x64xf32>
    %118 = arith.mulf %109, %86 : vector<8x64xf32>
    %119 = arith.mulf %103, %111 : vector<8x64xf32>
    %120 = arith.addf %118, %119 : vector<8x64xf32>
    %121 = math.tanh %120 : vector<8x64xf32>
    %122 = arith.mulf %117, %121 : vector<8x64xf32>
    %123 = vector.extract_strided_slice %122 {offsets = [0, 0], sizes = [8, 32], strides = [1, 1]} : vector<8x64xf32> to vector<8x32xf32>
    %c16_38 = arith.constant 16 : index
    %c0_39 = arith.constant 0 : index
    %124 = vector.load %arg4[%c16_38, %c0_39] : memref<32x32xf32, #tpu.memory_space<vmem>>, vector<8x32xf32>
    tpu.vector_store %arg4[%c16_38, %c0_39], %123 {strides = array<i32>} : memref<32x32xf32, #tpu.memory_space<vmem>>, vector<8x32xf32>,
    %125 = vector.extract_strided_slice %122 {offsets = [0, 32], sizes = [8, 32], strides = [1, 1]} : vector<8x64xf32> to vector<8x32xf32>
    %c8_40 = arith.constant 8 : index
    %c0_41 = arith.constant 0 : index
    %126 = vector.load %arg5[%c8_40, %c0_41] : memref<32x32xf32, #tpu.memory_space<vmem>>, vector<8x32xf32>
    tpu.vector_store %arg5[%c8_40, %c0_41], %125 {strides = array<i32>} : memref<32x32xf32, #tpu.memory_space<vmem>>, vector<8x32xf32>,
    %cst_42 = arith.constant dense<0.000000e+00> : vector<8x256xf32>
    %127 = tpu.matmul %122, %3, %cst_42 {dimension_numbers = #tpu.dot_dimension_numbers<[1], [0], [0], [1], [0, 0, 1, 1], [], []>} : vector<8x64xf32>, vector<64x256xf32>, vector<8x256xf32> -> vector<8x256xf32>
    %c24_43 = arith.constant 24 : index
    %c0_44 = arith.constant 0 : index
    %128 = vector.load %arg1[%c24_43, %c0_44] : memref<32x256xf32, #tpu.memory_space<vmem>>, vector<8x256xf32>
    %c0_45 = arith.constant 0 : index
    %c0_46 = arith.constant 0 : index
    %129 = vector.load %arg2[%c0_45, %c0_46] : memref<32x256xf32, #tpu.memory_space<vmem>>, vector<8x256xf32>
    %130 = arith.select %22, %128, %129 : vector<8x256xi1>, vector<8x256xf32>
    %131 = arith.addf %130, %127 : vector<8x256xf32>
    %132 = vector.extract_strided_slice %131 {offsets = [0, 0], sizes = [8, 64], strides = [1, 1]} : vector<8x256xf32> to vector<8x64xf32>
    %133 = arith.negf %132 : vector<8x64xf32>
    %134 = math.exp %133 : vector<8x64xf32>
    %cst_47 = arith.constant 1.000000e+00 : f32
    %135 = vector.broadcast %cst_47 : f32 to vector<8x64xf32>
    %136 = arith.addf %135, %134 : vector<8x64xf32>
    %137 = arith.divf %135, %136 : vector<8x64xf32>
    %138 = vector.extract_strided_slice %131 {offsets = [0, 64], sizes = [8, 64], strides = [1, 1]} : vector<8x256xf32> to vector<8x64xf32>
    %139 = arith.negf %138 : vector<8x64xf32>
    %140 = math.exp %139 : vector<8x64xf32>
    %cst_48 = arith.constant 1.000000e+00 : f32
    %141 = vector.broadcast %cst_48 : f32 to vector<8x64xf32>
    %142 = arith.addf %141, %140 : vector<8x64xf32>
    %143 = arith.divf %141, %142 : vector<8x64xf32>
    %144 = vector.extract_strided_slice %131 {offsets = [0, 128], sizes = [8, 64], strides = [1, 1]} : vector<8x256xf32> to vector<8x64xf32>
    %145 = math.tanh %144 : vector<8x64xf32>
    %146 = vector.extract_strided_slice %131 {offsets = [0, 192], sizes = [8, 64], strides = [1, 1]} : vector<8x256xf32> to vector<8x64xf32>
    %147 = arith.negf %146 : vector<8x64xf32>
    %148 = math.exp %147 : vector<8x64xf32>
    %cst_49 = arith.constant 1.000000e+00 : f32
    %149 = vector.broadcast %cst_49 : f32 to vector<8x64xf32>
    %150 = arith.addf %149, %148 : vector<8x64xf32>
    %151 = arith.divf %149, %150 : vector<8x64xf32>
    %152 = arith.mulf %143, %120 : vector<8x64xf32>
    %153 = arith.mulf %137, %145 : vector<8x64xf32>
    %154 = arith.addf %152, %153 : vector<8x64xf32>
    %155 = math.tanh %154 : vector<8x64xf32>
    %156 = arith.mulf %151, %155 : vector<8x64xf32>
    %157 = vector.extract_strided_slice %156 {offsets = [0, 0], sizes = [8, 32], strides = [1, 1]} : vector<8x64xf32> to vector<8x32xf32>
    %c24_50 = arith.constant 24 : index
    %c0_51 = arith.constant 0 : index
    %158 = vector.load %arg4[%c24_50, %c0_51] : memref<32x32xf32, #tpu.memory_space<vmem>>, vector<8x32xf32>
    tpu.vector_store %arg4[%c24_50, %c0_51], %157 {strides = array<i32>} : memref<32x32xf32, #tpu.memory_space<vmem>>, vector<8x32xf32>,
    %159 = vector.extract_strided_slice %156 {offsets = [0, 32], sizes = [8, 32], strides = [1, 1]} : vector<8x64xf32> to vector<8x32xf32>
    %c0_52 = arith.constant 0 : index
    %c0_53 = arith.constant 0 : index
    %160 = vector.load %arg5[%c0_52, %c0_53] : memref<32x32xf32, #tpu.memory_space<vmem>>, vector<8x32xf32>
    tpu.vector_store %arg5[%c0_52, %c0_53], %159 {strides = array<i32>} : memref<32x32xf32, #tpu.memory_space<vmem>>, vector<8x32xf32>,
    %c0_54 = arith.constant 0 : index
    %c0_55 = arith.constant 0 : index
    %161 = vector.load %arg6[%c0_54, %c0_55] : memref<8x64xf32, #tpu.memory_space<vmem>>, vector<8x64xf32>
    tpu.vector_store %arg6[%c0_54, %c0_55], %156 {strides = array<i32>} : memref<8x64xf32, #tpu.memory_space<vmem>>, vector<8x64xf32>,
    %c0_56 = arith.constant 0 : index
    %c0_57 = arith.constant 0 : index
    %162 = vector.load %arg7[%c0_56, %c0_57] : memref<8x64xf32, #tpu.memory_space<vmem>>, vector<8x64xf32>
    tpu.vector_store %arg7[%c0_56, %c0_57], %154 {strides = array<i32>} : memref<8x64xf32, #tpu.memory_space<vmem>>, vector<8x64xf32>,
    return
  }
  func.func @transform_0(%arg0: i32) -> (i32, i32) {
    %c0_i32 = arith.constant 0 : i32
    %c0_i32_0 = arith.constant 0 : i32
    return %arg0, %c0_i32 : i32, i32
  }
  func.func @transform_1(%arg0: i32) -> (i32, i32) {
    %c1_i32 = arith.constant 1 : i32
    %0 = arith.subi %c1_i32, %arg0 : i32
    %c0_i32 = arith.constant 0 : i32
    %c0_i32_0 = arith.constant 0 : i32
    return %0, %c0_i32 : i32, i32
  }
  func.func @transform_2(%arg0: i32) -> (i32, i32) {
    %c0_i32 = arith.constant 0 : i32
    %c0_i32_0 = arith.constant 0 : i32
    %c0_i32_1 = arith.constant 0 : i32
    return %c0_i32, %c0_i32_0 : i32, i32
  }
  func.func @transform_3(%arg0: i32) -> (i32, i32) {
    %c0_i32 = arith.constant 0 : i32
    %c0_i32_0 = arith.constant 0 : i32
    return %arg0, %c0_i32 : i32, i32
  }
  func.func @transform_4(%arg0: i32) -> (i32, i32) {
    %c1_i32 = arith.constant 1 : i32
    %0 = arith.subi %c1_i32, %arg0 : i32
    %c0_i32 = arith.constant 0 : i32
    %c0_i32_0 = arith.constant 0 : i32
    return %0, %c0_i32 : i32, i32
  }
}

module attributes {stable_mosaic.version = 11 : i64} {
  func.func @_proj_kernel(%arg0: i32, %arg1: memref<32x32xf32, #tpu.memory_space<vmem>>, %arg2: memref<32x32xf32, #tpu.memory_space<vmem>>, %arg3: memref<32x256xbf16, #tpu.memory_space<vmem>>, %arg4: memref<32x256xbf16, #tpu.memory_space<vmem>>, %arg5: memref<1x256xf32, #tpu.memory_space<vmem>>, %arg6: memref<32x256xf32, #tpu.memory_space<vmem>>) attributes {dimension_semantics = [#tpu.dimension_semantics<parallel>], iteration_bounds = array<i64: 2>, scalar_prefetch = 0 : i64, scratch_operands = 0 : i64, tpu.core_type = #tpu.core_type<tc>, window_params = [{transform_indices = @transform_0, window_bounds = array<i64: 32, 32>}, {transform_indices = @transform_1, window_bounds = array<i64: 32, 32>}, {pipeline_mode = #tpu.pipeline_mode<synchronous>, transform_indices = @transform_2, window_bounds = array<i64: 32, 256>}, {pipeline_mode = #tpu.pipeline_mode<synchronous>, transform_indices = @transform_3, window_bounds = array<i64: 32, 256>}, {pipeline_mode = #tpu.pipeline_mode<synchronous>, transform_indices = @transform_4, window_bounds = array<i64: 1, 256>}, {transform_indices = @transform_5, window_bounds = array<i64: 32, 256>}]} {
    %c0 = arith.constant 0 : index
    %c0_0 = arith.constant 0 : index
    %0 = vector.load %arg1[%c0, %c0_0] : memref<32x32xf32, #tpu.memory_space<vmem>>, vector<32x32xf32>
    %1 = arith.truncf %0 : vector<32x32xf32> to vector<32x32xbf16>
    %c0_1 = arith.constant 0 : index
    %c0_2 = arith.constant 0 : index
    %2 = vector.load %arg3[%c0_1, %c0_2] : memref<32x256xbf16, #tpu.memory_space<vmem>>, vector<32x256xbf16>
    %cst = arith.constant dense<0.000000e+00> : vector<32x256xf32>
    %3 = tpu.matmul %1, %2, %cst {dimension_numbers = #tpu.dot_dimension_numbers<[1], [0], [0], [1], [0, 0, 1, 1], [], []>} : vector<32x32xbf16>, vector<32x256xbf16>, vector<32x256xf32> -> vector<32x256xf32>
    %c0_3 = arith.constant 0 : index
    %c0_4 = arith.constant 0 : index
    %4 = vector.load %arg2[%c0_3, %c0_4] : memref<32x32xf32, #tpu.memory_space<vmem>>, vector<32x32xf32>
    %5 = arith.truncf %4 : vector<32x32xf32> to vector<32x32xbf16>
    %c0_5 = arith.constant 0 : index
    %c0_6 = arith.constant 0 : index
    %6 = vector.load %arg4[%c0_5, %c0_6] : memref<32x256xbf16, #tpu.memory_space<vmem>>, vector<32x256xbf16>
    %cst_7 = arith.constant dense<0.000000e+00> : vector<32x256xf32>
    %7 = tpu.matmul %5, %6, %cst_7 {dimension_numbers = #tpu.dot_dimension_numbers<[1], [0], [0], [1], [0, 0, 1, 1], [], []>} : vector<32x32xbf16>, vector<32x256xbf16>, vector<32x256xf32> -> vector<32x256xf32>
    %8 = arith.addf %3, %7 : vector<32x256xf32>
    %c0_8 = arith.constant 0 : index
    %c0_9 = arith.constant 0 : index
    %9 = vector.load %arg5[%c0_8, %c0_9] : memref<1x256xf32, #tpu.memory_space<vmem>>, vector<1x256xf32>
    %10 = vector.broadcast %9 : vector<1x256xf32> to vector<32x256xf32>
    %11 = arith.addf %8, %10 : vector<32x256xf32>
    %c0_10 = arith.constant 0 : index
    %c0_11 = arith.constant 0 : index
    %12 = vector.load %arg6[%c0_10, %c0_11] : memref<32x256xf32, #tpu.memory_space<vmem>>, vector<32x256xf32>
    tpu.vector_store %arg6[%c0_10, %c0_11], %11 {strides = array<i32>} : memref<32x256xf32, #tpu.memory_space<vmem>>, vector<32x256xf32>,
    return
  }
  func.func @transform_0(%arg0: i32) -> (i32, i32) {
    %c0_i32 = arith.constant 0 : i32
    %c0_i32_0 = arith.constant 0 : i32
    return %arg0, %c0_i32 : i32, i32
  }
  func.func @transform_1(%arg0: i32) -> (i32, i32) {
    %c0_i32 = arith.constant 0 : i32
    %c0_i32_0 = arith.constant 0 : i32
    return %arg0, %c0_i32 : i32, i32
  }
  func.func @transform_2(%arg0: i32) -> (i32, i32) {
    %c0_i32 = arith.constant 0 : i32
    %c0_i32_0 = arith.constant 0 : i32
    %c0_i32_1 = arith.constant 0 : i32
    return %c0_i32, %c0_i32_0 : i32, i32
  }
  func.func @transform_3(%arg0: i32) -> (i32, i32) {
    %c0_i32 = arith.constant 0 : i32
    %c0_i32_0 = arith.constant 0 : i32
    %c0_i32_1 = arith.constant 0 : i32
    return %c0_i32, %c0_i32_0 : i32, i32
  }
  func.func @transform_4(%arg0: i32) -> (i32, i32) {
    %c0_i32 = arith.constant 0 : i32
    %c0_i32_0 = arith.constant 0 : i32
    %c0_i32_1 = arith.constant 0 : i32
    return %c0_i32, %c0_i32_0 : i32, i32
  }
  func.func @transform_5(%arg0: i32) -> (i32, i32) {
    %c0_i32 = arith.constant 0 : i32
    %c0_i32_0 = arith.constant 0 : i32
    return %arg0, %c0_i32 : i32, i32
  }
}

module attributes {stable_mosaic.version = 11 : i64} {
  func.func @_recurrence_kernel(%arg0: i32, %arg1: memref<32x256xf32, #tpu.memory_space<vmem>>, %arg2: memref<32x256xf32, #tpu.memory_space<vmem>>, %arg3: memref<64x256xf32, #tpu.memory_space<vmem>>, %arg4: memref<32x5xf32, #tpu.memory_space<vmem>>, %arg5: memref<32x5xf32, #tpu.memory_space<vmem>>, %arg6: memref<1x5xf32, #tpu.memory_space<vmem>>, %arg7: memref<8x5xf32, #tpu.memory_space<vmem>>, %arg8: memref<8x64xf32, #tpu.memory_space<vmem>>, %arg9: memref<8x64xf32, #tpu.memory_space<vmem>>) attributes {dimension_semantics = [#tpu.dimension_semantics<arbitrary>], iteration_bounds = array<i64: 2>, scalar_prefetch = 0 : i64, scratch_operands = 2 : i64, tpu.core_type = #tpu.core_type<tc>, window_params = [{transform_indices = @transform_0, window_bounds = array<i64: 32, 256>}, {transform_indices = @transform_1, window_bounds = array<i64: 32, 256>}, {pipeline_mode = #tpu.pipeline_mode<synchronous>, transform_indices = @transform_2, window_bounds = array<i64: 64, 256>}, {pipeline_mode = #tpu.pipeline_mode<synchronous>, transform_indices = @transform_3, window_bounds = array<i64: 32, 5>}, {pipeline_mode = #tpu.pipeline_mode<synchronous>, transform_indices = @transform_4, window_bounds = array<i64: 32, 5>}, {pipeline_mode = #tpu.pipeline_mode<synchronous>, transform_indices = @transform_5, window_bounds = array<i64: 1, 5>}, {pipeline_mode = #tpu.pipeline_mode<synchronous>, transform_indices = @transform_6, window_bounds = array<i64: 8, 5>}]} {
    %c0_i32 = arith.constant 0 : i32
    %0 = arith.cmpi eq, %arg0, %c0_i32 : i32
    %1 = arith.extui %0 : i1 to i32
    %c0_i32_0 = arith.constant 0 : i32
    %2 = arith.cmpi ne, %1, %c0_i32_0 : i32
    scf.if %2 {
      %cst_46 = arith.constant 0.000000e+00 : f32
      %155 = vector.broadcast %cst_46 : f32 to vector<8x64xf32>
      %c0_47 = arith.constant 0 : index
      %c0_48 = arith.constant 0 : index
      %156 = vector.load %arg8[%c0_47, %c0_48] : memref<8x64xf32, #tpu.memory_space<vmem>>, vector<8x64xf32>
      tpu.vector_store %arg8[%c0_47, %c0_48], %155 {strides = array<i32>} : memref<8x64xf32, #tpu.memory_space<vmem>>, vector<8x64xf32>,
      %cst_49 = arith.constant 0.000000e+00 : f32
      %157 = vector.broadcast %cst_49 : f32 to vector<8x64xf32>
      %c0_50 = arith.constant 0 : index
      %c0_51 = arith.constant 0 : index
      %158 = vector.load %arg9[%c0_50, %c0_51] : memref<8x64xf32, #tpu.memory_space<vmem>>, vector<8x64xf32>
      tpu.vector_store %arg9[%c0_50, %c0_51], %157 {strides = array<i32>} : memref<8x64xf32, #tpu.memory_space<vmem>>, vector<8x64xf32>,
    } else {
    }
    %c0 = arith.constant 0 : index
    %c0_1 = arith.constant 0 : index
    %3 = vector.load %arg3[%c0, %c0_1] : memref<64x256xf32, #tpu.memory_space<vmem>>, vector<64x256xf32>
    %4 = tpu.iota {dimensions = array<i32: 1>} : vector<8x256xi32>
    %c64_i32 = arith.constant 64 : i32
    %c0_i32_2 = arith.constant 0 : i32
    %5 = arith.cmpi eq, %c64_i32, %c0_i32_2 : i32
    %c1_i32 = arith.constant 1 : i32
    %6 = arith.select %5, %c1_i32, %c64_i32 : i32
    %7 = vector.broadcast %6 : i32 to vector<8x256xi32>
    %8 = arith.remsi %4, %7 : vector<8x256xi32>
    %c0_i32_3 = arith.constant 0 : i32
    %9 = vector.broadcast %c0_i32_3 : i32 to vector<8x256xi32>
    %10 = arith.cmpi ne, %8, %9 : vector<8x256xi32>
    %c0_i32_4 = arith.constant 0 : i32
    %11 = vector.broadcast %c0_i32_4 : i32 to vector<8x256xi32>
    %12 = arith.cmpi slt, %8, %11 : vector<8x256xi32>
    %c0_i32_5 = arith.constant 0 : i32
    %13 = arith.cmpi slt, %6, %c0_i32_5 : i32
    %14 = vector.broadcast %13 : i1 to vector<8x256xi1>
    %15 = vector.broadcast %14 : vector<8x256xi1> to vector<8x256xi1>
    %16 = arith.xori %12, %15 : vector<8x256xi1>
    %17 = arith.andi %16, %10 : vector<8x256xi1>
    %18 = vector.broadcast %6 : i32 to vector<8x256xi32>
    %19 = arith.addi %8, %18 : vector<8x256xi32>
    %20 = arith.select %17, %19, %8 : vector<8x256xi1>, vector<8x256xi32>
    %c32_i32 = arith.constant 32 : i32
    %21 = vector.broadcast %c32_i32 : i32 to vector<8x256xi32>
    %22 = arith.cmpi slt, %20, %21 : vector<8x256xi32>
    %c0_6 = arith.constant 0 : index
    %c0_7 = arith.constant 0 : index
    %23 = vector.load %arg8[%c0_6, %c0_7] : memref<8x64xf32, #tpu.memory_space<vmem>>, vector<8x64xf32>
    %c0_8 = arith.constant 0 : index
    %c0_9 = arith.constant 0 : index
    %24 = vector.load %arg9[%c0_8, %c0_9] : memref<8x64xf32, #tpu.memory_space<vmem>>, vector<8x64xf32>
    %cst = arith.constant dense<0.000000e+00> : vector<8x256xf32>
    %25 = tpu.matmul %23, %3, %cst {dimension_numbers = #tpu.dot_dimension_numbers<[1], [0], [0], [1], [0, 0, 1, 1], [], []>} : vector<8x64xf32>, vector<64x256xf32>, vector<8x256xf32> -> vector<8x256xf32>
    %c0_10 = arith.constant 0 : index
    %c0_11 = arith.constant 0 : index
    %26 = vector.load %arg1[%c0_10, %c0_11] : memref<32x256xf32, #tpu.memory_space<vmem>>, vector<8x256xf32>
    %c24 = arith.constant 24 : index
    %c0_12 = arith.constant 0 : index
    %27 = vector.load %arg2[%c24, %c0_12] : memref<32x256xf32, #tpu.memory_space<vmem>>, vector<8x256xf32>
    %28 = arith.select %22, %26, %27 : vector<8x256xi1>, vector<8x256xf32>
    %29 = arith.addf %28, %25 : vector<8x256xf32>
    %30 = vector.extract_strided_slice %29 {offsets = [0, 0], sizes = [8, 64], strides = [1, 1]} : vector<8x256xf32> to vector<8x64xf32>
    %31 = arith.negf %30 : vector<8x64xf32>
    %32 = math.exp %31 : vector<8x64xf32>
    %cst_13 = arith.constant 1.000000e+00 : f32
    %33 = vector.broadcast %cst_13 : f32 to vector<8x64xf32>
    %34 = arith.addf %33, %32 : vector<8x64xf32>
    %35 = arith.divf %33, %34 : vector<8x64xf32>
    %36 = vector.extract_strided_slice %29 {offsets = [0, 64], sizes = [8, 64], strides = [1, 1]} : vector<8x256xf32> to vector<8x64xf32>
    %37 = arith.negf %36 : vector<8x64xf32>
    %38 = math.exp %37 : vector<8x64xf32>
    %cst_14 = arith.constant 1.000000e+00 : f32
    %39 = vector.broadcast %cst_14 : f32 to vector<8x64xf32>
    %40 = arith.addf %39, %38 : vector<8x64xf32>
    %41 = arith.divf %39, %40 : vector<8x64xf32>
    %42 = vector.extract_strided_slice %29 {offsets = [0, 128], sizes = [8, 64], strides = [1, 1]} : vector<8x256xf32> to vector<8x64xf32>
    %43 = math.tanh %42 : vector<8x64xf32>
    %44 = vector.extract_strided_slice %29 {offsets = [0, 192], sizes = [8, 64], strides = [1, 1]} : vector<8x256xf32> to vector<8x64xf32>
    %45 = arith.negf %44 : vector<8x64xf32>
    %46 = math.exp %45 : vector<8x64xf32>
    %cst_15 = arith.constant 1.000000e+00 : f32
    %47 = vector.broadcast %cst_15 : f32 to vector<8x64xf32>
    %48 = arith.addf %47, %46 : vector<8x64xf32>
    %49 = arith.divf %47, %48 : vector<8x64xf32>
    %50 = arith.mulf %41, %24 : vector<8x64xf32>
    %51 = arith.mulf %35, %43 : vector<8x64xf32>
    %52 = arith.addf %50, %51 : vector<8x64xf32>
    %53 = math.tanh %52 : vector<8x64xf32>
    %54 = arith.mulf %49, %53 : vector<8x64xf32>
    %55 = vector.extract_strided_slice %54 {offsets = [0, 32], sizes = [8, 32], strides = [1, 1]} : vector<8x64xf32> to vector<8x32xf32>
    %cst_16 = arith.constant dense<0.000000e+00> : vector<8x256xf32>
    %56 = tpu.matmul %54, %3, %cst_16 {dimension_numbers = #tpu.dot_dimension_numbers<[1], [0], [0], [1], [0, 0, 1, 1], [], []>} : vector<8x64xf32>, vector<64x256xf32>, vector<8x256xf32> -> vector<8x256xf32>
    %c8 = arith.constant 8 : index
    %c0_17 = arith.constant 0 : index
    %57 = vector.load %arg1[%c8, %c0_17] : memref<32x256xf32, #tpu.memory_space<vmem>>, vector<8x256xf32>
    %c16 = arith.constant 16 : index
    %c0_18 = arith.constant 0 : index
    %58 = vector.load %arg2[%c16, %c0_18] : memref<32x256xf32, #tpu.memory_space<vmem>>, vector<8x256xf32>
    %59 = arith.select %22, %57, %58 : vector<8x256xi1>, vector<8x256xf32>
    %60 = arith.addf %59, %56 : vector<8x256xf32>
    %61 = vector.extract_strided_slice %60 {offsets = [0, 0], sizes = [8, 64], strides = [1, 1]} : vector<8x256xf32> to vector<8x64xf32>
    %62 = arith.negf %61 : vector<8x64xf32>
    %63 = math.exp %62 : vector<8x64xf32>
    %cst_19 = arith.constant 1.000000e+00 : f32
    %64 = vector.broadcast %cst_19 : f32 to vector<8x64xf32>
    %65 = arith.addf %64, %63 : vector<8x64xf32>
    %66 = arith.divf %64, %65 : vector<8x64xf32>
    %67 = vector.extract_strided_slice %60 {offsets = [0, 64], sizes = [8, 64], strides = [1, 1]} : vector<8x256xf32> to vector<8x64xf32>
    %68 = arith.negf %67 : vector<8x64xf32>
    %69 = math.exp %68 : vector<8x64xf32>
    %cst_20 = arith.constant 1.000000e+00 : f32
    %70 = vector.broadcast %cst_20 : f32 to vector<8x64xf32>
    %71 = arith.addf %70, %69 : vector<8x64xf32>
    %72 = arith.divf %70, %71 : vector<8x64xf32>
    %73 = vector.extract_strided_slice %60 {offsets = [0, 128], sizes = [8, 64], strides = [1, 1]} : vector<8x256xf32> to vector<8x64xf32>
    %74 = math.tanh %73 : vector<8x64xf32>
    %75 = vector.extract_strided_slice %60 {offsets = [0, 192], sizes = [8, 64], strides = [1, 1]} : vector<8x256xf32> to vector<8x64xf32>
    %76 = arith.negf %75 : vector<8x64xf32>
    %77 = math.exp %76 : vector<8x64xf32>
    %cst_21 = arith.constant 1.000000e+00 : f32
    %78 = vector.broadcast %cst_21 : f32 to vector<8x64xf32>
    %79 = arith.addf %78, %77 : vector<8x64xf32>
    %80 = arith.divf %78, %79 : vector<8x64xf32>
    %81 = arith.mulf %72, %52 : vector<8x64xf32>
    %82 = arith.mulf %66, %74 : vector<8x64xf32>
    %83 = arith.addf %81, %82 : vector<8x64xf32>
    %84 = math.tanh %83 : vector<8x64xf32>
    %85 = arith.mulf %80, %84 : vector<8x64xf32>
    %cst_22 = arith.constant dense<0.000000e+00> : vector<8x256xf32>
    %86 = tpu.matmul %85, %3, %cst_22 {dimension_numbers = #tpu.dot_dimension_numbers<[1], [0], [0], [1], [0, 0, 1, 1], [], []>} : vector<8x64xf32>, vector<64x256xf32>, vector<8x256xf32> -> vector<8x256xf32>
    %c16_23 = arith.constant 16 : index
    %c0_24 = arith.constant 0 : index
    %87 = vector.load %arg1[%c16_23, %c0_24] : memref<32x256xf32, #tpu.memory_space<vmem>>, vector<8x256xf32>
    %c8_25 = arith.constant 8 : index
    %c0_26 = arith.constant 0 : index
    %88 = vector.load %arg2[%c8_25, %c0_26] : memref<32x256xf32, #tpu.memory_space<vmem>>, vector<8x256xf32>
    %89 = arith.select %22, %87, %88 : vector<8x256xi1>, vector<8x256xf32>
    %90 = arith.addf %89, %86 : vector<8x256xf32>
    %91 = vector.extract_strided_slice %90 {offsets = [0, 0], sizes = [8, 64], strides = [1, 1]} : vector<8x256xf32> to vector<8x64xf32>
    %92 = arith.negf %91 : vector<8x64xf32>
    %93 = math.exp %92 : vector<8x64xf32>
    %cst_27 = arith.constant 1.000000e+00 : f32
    %94 = vector.broadcast %cst_27 : f32 to vector<8x64xf32>
    %95 = arith.addf %94, %93 : vector<8x64xf32>
    %96 = arith.divf %94, %95 : vector<8x64xf32>
    %97 = vector.extract_strided_slice %90 {offsets = [0, 64], sizes = [8, 64], strides = [1, 1]} : vector<8x256xf32> to vector<8x64xf32>
    %98 = arith.negf %97 : vector<8x64xf32>
    %99 = math.exp %98 : vector<8x64xf32>
    %cst_28 = arith.constant 1.000000e+00 : f32
    %100 = vector.broadcast %cst_28 : f32 to vector<8x64xf32>
    %101 = arith.addf %100, %99 : vector<8x64xf32>
    %102 = arith.divf %100, %101 : vector<8x64xf32>
    %103 = vector.extract_strided_slice %90 {offsets = [0, 128], sizes = [8, 64], strides = [1, 1]} : vector<8x256xf32> to vector<8x64xf32>
    %104 = math.tanh %103 : vector<8x64xf32>
    %105 = vector.extract_strided_slice %90 {offsets = [0, 192], sizes = [8, 64], strides = [1, 1]} : vector<8x256xf32> to vector<8x64xf32>
    %106 = arith.negf %105 : vector<8x64xf32>
    %107 = math.exp %106 : vector<8x64xf32>
    %cst_29 = arith.constant 1.000000e+00 : f32
    %108 = vector.broadcast %cst_29 : f32 to vector<8x64xf32>
    %109 = arith.addf %108, %107 : vector<8x64xf32>
    %110 = arith.divf %108, %109 : vector<8x64xf32>
    %111 = arith.mulf %102, %83 : vector<8x64xf32>
    %112 = arith.mulf %96, %104 : vector<8x64xf32>
    %113 = arith.addf %111, %112 : vector<8x64xf32>
    %114 = math.tanh %113 : vector<8x64xf32>
    %115 = arith.mulf %110, %114 : vector<8x64xf32>
    %cst_30 = arith.constant dense<0.000000e+00> : vector<8x256xf32>
    %116 = tpu.matmul %115, %3, %cst_30 {dimension_numbers = #tpu.dot_dimension_numbers<[1], [0], [0], [1], [0, 0, 1, 1], [], []>} : vector<8x64xf32>, vector<64x256xf32>, vector<8x256xf32> -> vector<8x256xf32>
    %c24_31 = arith.constant 24 : index
    %c0_32 = arith.constant 0 : index
    %117 = vector.load %arg1[%c24_31, %c0_32] : memref<32x256xf32, #tpu.memory_space<vmem>>, vector<8x256xf32>
    %c0_33 = arith.constant 0 : index
    %c0_34 = arith.constant 0 : index
    %118 = vector.load %arg2[%c0_33, %c0_34] : memref<32x256xf32, #tpu.memory_space<vmem>>, vector<8x256xf32>
    %119 = arith.select %22, %117, %118 : vector<8x256xi1>, vector<8x256xf32>
    %120 = arith.addf %119, %116 : vector<8x256xf32>
    %121 = vector.extract_strided_slice %120 {offsets = [0, 0], sizes = [8, 64], strides = [1, 1]} : vector<8x256xf32> to vector<8x64xf32>
    %122 = arith.negf %121 : vector<8x64xf32>
    %123 = math.exp %122 : vector<8x64xf32>
    %cst_35 = arith.constant 1.000000e+00 : f32
    %124 = vector.broadcast %cst_35 : f32 to vector<8x64xf32>
    %125 = arith.addf %124, %123 : vector<8x64xf32>
    %126 = arith.divf %124, %125 : vector<8x64xf32>
    %127 = vector.extract_strided_slice %120 {offsets = [0, 64], sizes = [8, 64], strides = [1, 1]} : vector<8x256xf32> to vector<8x64xf32>
    %128 = arith.negf %127 : vector<8x64xf32>
    %129 = math.exp %128 : vector<8x64xf32>
    %cst_36 = arith.constant 1.000000e+00 : f32
    %130 = vector.broadcast %cst_36 : f32 to vector<8x64xf32>
    %131 = arith.addf %130, %129 : vector<8x64xf32>
    %132 = arith.divf %130, %131 : vector<8x64xf32>
    %133 = vector.extract_strided_slice %120 {offsets = [0, 128], sizes = [8, 64], strides = [1, 1]} : vector<8x256xf32> to vector<8x64xf32>
    %134 = math.tanh %133 : vector<8x64xf32>
    %135 = vector.extract_strided_slice %120 {offsets = [0, 192], sizes = [8, 64], strides = [1, 1]} : vector<8x256xf32> to vector<8x64xf32>
    %136 = arith.negf %135 : vector<8x64xf32>
    %137 = math.exp %136 : vector<8x64xf32>
    %cst_37 = arith.constant 1.000000e+00 : f32
    %138 = vector.broadcast %cst_37 : f32 to vector<8x64xf32>
    %139 = arith.addf %138, %137 : vector<8x64xf32>
    %140 = arith.divf %138, %139 : vector<8x64xf32>
    %141 = arith.mulf %132, %113 : vector<8x64xf32>
    %142 = arith.mulf %126, %134 : vector<8x64xf32>
    %143 = arith.addf %141, %142 : vector<8x64xf32>
    %144 = math.tanh %143 : vector<8x64xf32>
    %145 = arith.mulf %140, %144 : vector<8x64xf32>
    %146 = vector.extract_strided_slice %145 {offsets = [0, 0], sizes = [8, 32], strides = [1, 1]} : vector<8x64xf32> to vector<8x32xf32>
    %c0_38 = arith.constant 0 : index
    %c0_39 = arith.constant 0 : index
    %147 = vector.load %arg8[%c0_38, %c0_39] : memref<8x64xf32, #tpu.memory_space<vmem>>, vector<8x64xf32>
    tpu.vector_store %arg8[%c0_38, %c0_39], %145 {strides = array<i32>} : memref<8x64xf32, #tpu.memory_space<vmem>>, vector<8x64xf32>,
    %c0_40 = arith.constant 0 : index
    %c0_41 = arith.constant 0 : index
    %148 = vector.load %arg9[%c0_40, %c0_41] : memref<8x64xf32, #tpu.memory_space<vmem>>, vector<8x64xf32>
    tpu.vector_store %arg9[%c0_40, %c0_41], %143 {strides = array<i32>} : memref<8x64xf32, #tpu.memory_space<vmem>>, vector<8x64xf32>,
    %c0_i32_42 = arith.constant 0 : i32
    %149 = arith.cmpi eq, %arg0, %c0_i32_42 : i32
    %150 = arith.extui %149 : i1 to i32
    %c0_i32_43 = arith.constant 0 : i32
    %151 = arith.cmpi ne, %150, %c0_i32_43 : i32
    scf.if %151 {
      %c0_46 = arith.constant 0 : index
      %c0_47 = arith.constant 0 : index
      %155 = vector.load %arg5[%c0_46, %c0_47] : memref<32x5xf32, #tpu.memory_space<vmem>>, vector<32x5xf32>
      %cst_48 = arith.constant dense<0.000000e+00> : vector<8x5xf32>
      %156 = tpu.matmul %55, %155, %cst_48 {dimension_numbers = #tpu.dot_dimension_numbers<[1], [0], [0], [1], [0, 0, 1, 1], [], []>} : vector<8x32xf32>, vector<32x5xf32>, vector<8x5xf32> -> vector<8x5xf32>
      %c0_49 = arith.constant 0 : index
      %c0_50 = arith.constant 0 : index
      %157 = vector.load %arg6[%c0_49, %c0_50] : memref<1x5xf32, #tpu.memory_space<vmem>>, vector<1x5xf32>
      %158 = vector.broadcast %157 : vector<1x5xf32> to vector<8x5xf32>
      %159 = arith.addf %156, %158 : vector<8x5xf32>
      %c0_51 = arith.constant 0 : index
      %c0_52 = arith.constant 0 : index
      %160 = vector.load %arg7[%c0_51, %c0_52] : memref<8x5xf32, #tpu.memory_space<vmem>>, vector<8x5xf32>
      tpu.vector_store %arg7[%c0_51, %c0_52], %159 {strides = array<i32>} : memref<8x5xf32, #tpu.memory_space<vmem>>, vector<8x5xf32>,
    } else {
    }
    %c1_i32_44 = arith.constant 1 : i32
    %152 = arith.cmpi eq, %arg0, %c1_i32_44 : i32
    %153 = arith.extui %152 : i1 to i32
    %c0_i32_45 = arith.constant 0 : i32
    %154 = arith.cmpi ne, %153, %c0_i32_45 : i32
    scf.if %154 {
      %c0_46 = arith.constant 0 : index
      %c0_47 = arith.constant 0 : index
      %155 = vector.load %arg7[%c0_46, %c0_47] : memref<8x5xf32, #tpu.memory_space<vmem>>, vector<8x5xf32>
      %c0_48 = arith.constant 0 : index
      %c0_49 = arith.constant 0 : index
      %156 = vector.load %arg4[%c0_48, %c0_49] : memref<32x5xf32, #tpu.memory_space<vmem>>, vector<32x5xf32>
      %cst_50 = arith.constant dense<0.000000e+00> : vector<8x5xf32>
      %157 = tpu.matmul %146, %156, %cst_50 {dimension_numbers = #tpu.dot_dimension_numbers<[1], [0], [0], [1], [0, 0, 1, 1], [], []>} : vector<8x32xf32>, vector<32x5xf32>, vector<8x5xf32> -> vector<8x5xf32>
      %158 = arith.addf %155, %157 : vector<8x5xf32>
      %c0_51 = arith.constant 0 : index
      %c0_52 = arith.constant 0 : index
      %159 = vector.load %arg7[%c0_51, %c0_52] : memref<8x5xf32, #tpu.memory_space<vmem>>, vector<8x5xf32>
      tpu.vector_store %arg7[%c0_51, %c0_52], %158 {strides = array<i32>} : memref<8x5xf32, #tpu.memory_space<vmem>>, vector<8x5xf32>,
    } else {
    }
    return
  }
  func.func @transform_0(%arg0: i32) -> (i32, i32) {
    %c0_i32 = arith.constant 0 : i32
    %c0_i32_0 = arith.constant 0 : i32
    return %arg0, %c0_i32 : i32, i32
  }
  func.func @transform_1(%arg0: i32) -> (i32, i32) {
    %c1_i32 = arith.constant 1 : i32
    %0 = arith.subi %c1_i32, %arg0 : i32
    %c0_i32 = arith.constant 0 : i32
    %c0_i32_0 = arith.constant 0 : i32
    return %0, %c0_i32 : i32, i32
  }
  func.func @transform_2(%arg0: i32) -> (i32, i32) {
    %c0_i32 = arith.constant 0 : i32
    %c0_i32_0 = arith.constant 0 : i32
    %c0_i32_1 = arith.constant 0 : i32
    return %c0_i32, %c0_i32_0 : i32, i32
  }
  func.func @transform_3(%arg0: i32) -> (i32, i32) {
    %c0_i32 = arith.constant 0 : i32
    %c0_i32_0 = arith.constant 0 : i32
    %c0_i32_1 = arith.constant 0 : i32
    return %c0_i32, %c0_i32_0 : i32, i32
  }
  func.func @transform_4(%arg0: i32) -> (i32, i32) {
    %c0_i32 = arith.constant 0 : i32
    %c0_i32_0 = arith.constant 0 : i32
    %c0_i32_1 = arith.constant 0 : i32
    return %c0_i32, %c0_i32_0 : i32, i32
  }
  func.func @transform_5(%arg0: i32) -> (i32, i32) {
    %c0_i32 = arith.constant 0 : i32
    %c0_i32_0 = arith.constant 0 : i32
    %c0_i32_1 = arith.constant 0 : i32
    return %c0_i32, %c0_i32_0 : i32, i32
  }
  func.func @transform_6(%arg0: i32) -> (i32, i32) {
    %c0_i32 = arith.constant 0 : i32
    %c0_i32_0 = arith.constant 0 : i32
    %c0_i32_1 = arith.constant 0 : i32
    return %c0_i32, %c0_i32_0 : i32, i32
  }
}

</mosaic_0001>

<bundles_post_ra>
// kernel: bilstm_forward.4
= control target key start
LH: loop header
LB: loop body
LE: loop exit
PB: predicated region body
PF: predicated region fallthrough
CT: control target
= control target key end

     0   :  { %8 = vsyncpa [#allocation3], 0  ;;  %s458_s12 = smov 0   ;;  %s485_s0 = inlined_call_operand.vmem [shape: f32[64,16], index: 0, kind: input, shape index: {}]   ;;  %s486_s1 = inlined_call_operand.hbm [shape: bf16[16,256], index: 1, kind: input, shape index: {}]   ;;  %s487_s2 = inlined_call_operand.vmem [shape: f32[1,256], index: 2, kind: input, shape index: {}]   ;;  %s488_s3 = inlined_call_operand.vmem [shape: f32[64,256], index: 3, kind: output, shape index: {}]  }
   0x1 LB: > { %s124_s15 = sshll.u32 %s486_s1, 4  ;;  %s341_s16 = sadd.s32 4294967295, %s433_s12   ;;  %s433_s12 = sphi %s458_s12, %s14_s12   ;;  %s125_s15 = int_to_ptr.hbm [resolvable:$true] %s124_s15 }
   0x2   : > { %p343_p0 = scmp.ge.s32.totalorder %s433_s12, 1  ;;  %p113_p1 = scmp.lt.s32.totalorder %s433_s12, 3 }
   0x3   : > { %p380_p2 = scmp.eq.s32.totalorder %s341_s16, 0  ;;  %s435_s17 = smov [#allocation2]  }
   0x4   : > { %p114_p3 = pnand %p343_p0, %p113_p1  ;;  %s126_s18 = sshll.u32 %s435_s17, 4  ;;  %s127_s18 = int_to_ptr.vmem [resolvable:$true] %s126_s18 }
   0x5   : > { %s436_s19 = smov 128   ;;  %s437_s20 = smov 8  }
   0x6   : > { %p376_p4 = pneg %p114_p3  ;;  %154 = sbr.rel (%p114_p3) target bundleno = 166 (0xa6), region = 32 }
   0x8   : > { %p377_p5 = pnand %p380_p2, %p376_p4 }
   0xa   : > { %379 = dma.hbm_to_vmem [thread:$0]  (!%p377_p5), %s125_s15, 256, %s127_s18, [#allocation3], %s436_s19, %s436_s19, %s437_s20  }
   0xb   : > { %428 = dma.done.wait (%p380_p2), [#allocation3], 256  }
   0xc   : > { %430 = vsyncadd (%p380_p2), [#allocation3], 4294967040  ;;  %s348_s21 = sshll.u32 %s341_s16, 2  ;;  %v355_v0 = vld [vmem:[#allocation2] sm:$0xf]  ;;  %vm218_vm0 = vcmask 130048  }
   0xd   : > { %p181_p6 = scmp.lt.s32.totalorder %s348_s21, 7  ;;  %v369_v1 = vld [vmem:[#allocation2 + $0x4] sm:$0xf0]  ;;  %v368_v2 = vld [vmem:[#allocation2 + $0x4] sm:$0xf] }
   0xe   : > { %v356_v3 = vor.u32 %v369_v1, %v355_v0  ;;  %v357_v4 = vld [vmem:[#allocation2 + $0x8] sm:$0xf0]  ;;  %v202_v12 = vld [vmem:[%s487_s2] sm:$0x3] }
   0xf   : > { %s490_s21 = smov (!%p181_p6, %s348_s21), 7  ;;  %v360_v7 = vor.u32 %v368_v2, %v357_v4  ;;  %v204_v13 = vperm.slane %v202_v12, 0  ;;  %v205_v14 = vperm.slane %v202_v12, 1 }
  0x10   : > { %s349_s22 = sshll.u32 %s490_s21, 3  ;;  %232 = vmatpush.bf16.msra.mxu0 %v356_v3  ;;  %370 = vmatpush.bf16.msra.mxu2 %v356_v3  ;;  %s367_s28 = sshll.u32 %s490_s21, 4 }
  0x11   : > { %s184_s25 = scalar_lea.vmem %s485_s0, %s349_s22  ;;  %251 = vmatpush.bf16.msra.mxu1 %v360_v7  ;;  %371 = vmatpush.bf16.msra.mxu3 %v360_v7  ;;  %s191_s4 = scalar_lea.vmem %s488_s3, %s367_s28 }
  0x12   : > { %v194_v5 = vld [vmem:[%s184_s25] sm:$0xff]  ;;  %v195_v6 = vld [vmem:[%s184_s25 + $0x8] sm:$0xff]  ;;  %v196_v9 = vld [vmem:[%s184_s25 + $0x10] sm:$0xff] }
  0x13   : > { %v198_v8 = vpack.c.bf16 %v195_v6, %v194_v5  ;;  %v197_v10 = vld [vmem:[%s184_s25 + $0x18] sm:$0xff] }
  0x14   : > { %v199_v11 = vpack.c.bf16 %v197_v10, %v196_v9 }
  0x15   : > { %361 = vmatmul.msk.bf16.vlgmr.msra.gmra.mxu0 %vm218_vm0, %v198_v8  ;;  %363 = vmatmul.msk.bf16.vlgmr.msra.gmra.mxu1 %vm218_vm0, %v198_v8 }
  0x16   : > { %362 = vmatmul.msk.bf16.vlgmr.msra.gmra.mxu2 %vm218_vm0, %v199_v11  ;;  %364 = vmatmul.msk.bf16.vlgmr.msra.gmra.mxu3 %vm218_vm0, %v199_v11 }
  0x92   : > { %v234_v15 = vpop.f32.mrf.mxu0  ;;  %v253_v17 = vpop.f32.mrf.mxu1 }
  0x93   : > { %v235_v16 = vadd.f32 %v234_v15, %v204_v13  ;;  %v254_v18 = vadd.f32 %v253_v17, %v205_v14 }
  0x95   : > { %263 = vst [vmem:[%s191_s4] sm:$0xff] %v235_v16 }
  0x96   : > { %264 = vst [vmem:[%s191_s4 + $0x8] sm:$0xff] %v254_v18 }
  0x99   : > { %v239_v19 = vpop.f32.mrf.mxu2  ;;  %v258_v20 = vpop.f32.mrf.mxu3 }
  0x9a   : > { %v236_v21 = vpop.f32.mrf.mxu0  ;;  %v255_v23 = vpop.f32.mrf.mxu1  ;;  %v240_v24 = vadd.f32 %v239_v19, %v204_v13  ;;  %v259_v26 = vadd.f32 %v258_v20, %v205_v14 }
  0x9b   : > { %v237_v22 = vadd.f32 %v236_v21, %v204_v13  ;;  %v256_v25 = vadd.f32 %v255_v23, %v205_v14 }
  0x9c   : > { %267 = vst [vmem:[%s191_s4 + $0x20] sm:$0xff] %v240_v24 }
  0x9d   : > { %265 = vst [vmem:[%s191_s4 + $0x10] sm:$0xff] %v237_v22 }
  0x9e   : > { %266 = vst [vmem:[%s191_s4 + $0x18] sm:$0xff] %v256_v25 }
  0x9f   : > { %268 = vst [vmem:[%s191_s4 + $0x28] sm:$0xff] %v259_v26 }
  0xa1   : > { %v241_v27 = vpop.f32.mrf.mxu2  ;;  %v260_v29 = vpop.f32.mrf.mxu3 }
  0xa2   : > { %v242_v28 = vadd.f32 %v241_v27, %v204_v13  ;;  %v261_v30 = vadd.f32 %v260_v29, %v205_v14 }
  0xa4   : > { %269 = vst [vmem:[%s191_s4 + $0x30] sm:$0xff] %v242_v28 }
  0xa5   : > { %270 = vst [vmem:[%s191_s4 + $0x38] sm:$0xff] %v261_v30 }
  0xa6 PF: > { %s14_s12 = sadd.s32 1, %s433_s12  }
  0xa7   : > { %p11_p7 = scmp.ge.s32.totalorder %s14_s12, 4  }
  0xa9   :  { %13 = sbr.rel (!%p11_p7) target bundleno = 1 (0x1), region = 67 }
  0xae   :  { %295 = vsyncpa [#allocation3], 1 }
  0xaf   :  { %297 = vsyncpa [#allocation3 + $0x1], 1 }

// kernel: bilstm_forward.6
= control target key start
LH: loop header
LB: loop body
LE: loop exit
PB: predicated region body
PF: predicated region fallthrough
CT: control target
= control target key end

     0   :  { %10 = vsyncpa [#allocation3], 0  ;;  %s907_s0 = inlined_call_operand.vmem [shape: f32[64,32], index: 0, kind: input, shape index: {}]   ;;  %s908_s1 = inlined_call_operand.vmem [shape: f32[64,32], index: 1, kind: input, shape index: {}]   ;;  %s909_s2 = inlined_call_operand.hbm [shape: bf16[32,256], index: 2, kind: input, shape index: {}]   ;;  %s910_s3 = inlined_call_operand.hbm [shape: bf16[32,256], index: 3, kind: input, shape index: {}]   ;;  %s911_s4 = inlined_call_operand.hbm [shape: f32[1,256], index: 4, kind: input, shape index: {}]   ;;  %s912_s5 = inlined_call_operand.vmem [shape: f32[64,256], index: 5, kind: output, shape index: {}]  }
   0x1   :  { %11 = vsyncpa [#allocation5], 0  ;;  %s824_s18 = smov 0  }
   0x2 LB: > { %s573_s19 = sadd.s32 4294967295, %s787_s18   ;;  %p575_p0 = scmp.ge.s32.totalorder %s787_s18, 1  ;;  %s787_s18 = sphi %s824_s18, %s17_s18  }
   0x3   : > { %p163_p1 = scmp.lt.s32.totalorder %s787_s18, 3  ;;  %p834_p2 = scmp.eq.s32.totalorder %s573_s19, 0 }
   0x4   : > { %s188_s23 = sshll.u32 %s910_s3, 4  ;;  %s174_s27 = sshll.u32 %s909_s2, 4  ;;  %s189_s23 = int_to_ptr.hbm [resolvable:$true] %s188_s23  ;;  %s175_s27 = int_to_ptr.hbm [resolvable:$true] %s174_s27 }
   0x5   : > { %p841_p3 = pnand %p575_p0, %p163_p1  ;;  %s789_s28 = smov [#allocation4]  }
   0x6   : > { %s190_s29 = sshll.u32 %s789_s28, 4  ;;  %s790_s30 = smov [#allocation2]   ;;  %s191_s29 = int_to_ptr.vmem [resolvable:$true] %s190_s29 }
   0x7   : > { %p654_p4 = pneg %p841_p3  ;;  %s176_s6 = sshll.u32 %s790_s30, 4  ;;  %s177_s6 = int_to_ptr.vmem [resolvable:$true] %s176_s6 }
   0x8   : > { %s203_s9 = sshll.u32 %s911_s4, 4  ;;  %s791_s10 = smov 128   ;;  %s204_s9 = int_to_ptr.hbm [resolvable:$true] %s203_s9 }
   0x9   : > { %p655_p5 = pnand %p834_p2, %p654_p4  ;;  %s792_s11 = smov 8  }
   0xa   : > { %s793_s12 = smov [#allocation6]   ;;  %236 = sbr.rel (%p841_p3) target bundleno = 192 (0xc0), region = 40 }
   0xb   : > { %660 = dma.hbm_to_vmem [thread:$0]  (!%p655_p5), %s189_s23, 512, %s191_s29, [#allocation5], %s791_s10, %s791_s10, %s792_s11  }
   0xc   : > { %657 = dma.hbm_to_vmem [thread:$0]  (!%p655_p5), %s175_s27, 512, %s177_s6, [#allocation3], %s791_s10, %s791_s10, %s792_s11  }
   0xd   : > { %s205_s13 = sshll.u32 %s793_s12, 4  ;;  %s206_s13 = int_to_ptr.vmem [resolvable:$true] %s205_s13 }
   0xe   : > { %663 = dma.hbm_to_vmem [thread:$0]  (!%p655_p5), %s204_s9, 32, %s206_s13, [#allocation5]  }
   0xf   : > { %778 = dma.done.wait (%p834_p2), [#allocation3], 512  }
  0x10   : > { %780 = vsyncadd (%p834_p2), [#allocation3], 4294966784 }
  0x11   : > { %782 = dma.done.wait (%p834_p2), [#allocation5], 544  }
  0x12   : > { %784 = vsyncadd (%p834_p2), [#allocation5], 4294966752  ;;  %s584_s14 = sshll.u32 %s573_s19, 2  ;;  %v601_v0 = vld [vmem:[#allocation4 + $0x10] sm:$0xf]  ;;  %vm341_vm0 = vcmask 261120  }
  0x13   : > { %p282_p6 = scmp.lt.s32.totalorder %s584_s14, 7  ;;  %v641_v1 = vld [vmem:[#allocation4 + $0x14] sm:$0xf0]  ;;  %v640_v2 = vld [vmem:[#allocation4 + $0x14] sm:$0xf] }
  0x14   : > { %v602_v3 = vor.u32 %v641_v1, %v601_v0  ;;  %v603_v4 = vld [vmem:[#allocation4 + $0x18] sm:$0xf0]  ;;  %v621_v5 = vld [vmem:[#allocation2 + $0x10] sm:$0xf]  ;;  %v637_v6 = vld [vmem:[#allocation2 + $0x14] sm:$0xf0] }
  0x15   : > { %s916_s14 = smov (!%p282_p6, %s584_s14), 7  ;;  %v606_v7 = vor.u32 %v640_v2, %v603_v4  ;;  %v622_v8 = vor.u32 %v637_v6, %v621_v5  ;;  %v636_v9 = vld [vmem:[#allocation2 + $0x14] sm:$0xf]  ;;  %v623_v10 = vld [vmem:[#allocation2 + $0x18] sm:$0xf0] }
  0x16   : > { %s585_s15 = sshll.u32 %s916_s14, 3  ;;  %v593_v11 = vld [vmem:[#allocation4] sm:$0xf]  ;;  %354 = vmatpush.bf16.msra.mxu0 %v602_v3  ;;  %v626_v12 = vor.u32 %v636_v9, %v623_v10  ;;  %v639_v13 = vld [vmem:[#allocation4 + $0x4] sm:$0xf0]  ;;  %s633_s23 = sshll.u32 %s916_s14, 4 }
  0x17   : > { %s873_s19 = scalar_lea.vmem %s908_s1, %s585_s15  ;;  %v638_v14 = vld [vmem:[#allocation4 + $0x4] sm:$0xf]  ;;  %v595_v15 = vld [vmem:[#allocation4 + $0x8] sm:$0xf0]  ;;  %s285_s22 = scalar_lea.vmem %s907_s0, %s585_s15  ;;  %373 = vmatpush.bf16.msra.mxu1 %v606_v7  ;;  %418 = vmatpush.bf16.msra.mxu2 %v622_v8  ;;  %v594_v16 = vor.u32 %v639_v13, %v593_v11  ;;  %v613_v18 = vld [vmem:[#allocation2] sm:$0xf] }
  0x18   : > { %v598_v17 = vor.u32 %v638_v14, %v595_v15  ;;  %v635_v19 = vld [vmem:[#allocation2 + $0x4] sm:$0xf0]  ;;  %v634_v20 = vld [vmem:[#allocation2 + $0x4] sm:$0xf]  ;;  %437 = vmatpush.bf16.msra.mxu3 %v626_v12  ;;  %v615_v22 = vld [vmem:[#allocation2 + $0x8] sm:$0xf0]  ;;  %s894_s26 = scalar_lea.vmem %s912_s5, %s633_s23 }
  0x19   : > { %v614_v21 = vor.u32 %v635_v19, %v613_v18  ;;  %v311_v23 = vld [vmem:[%s873_s19] sm:$0xff]  ;;  %v312_v24 = vld [vmem:[%s873_s19 + $0x8] sm:$0xff]  ;;  %v618_v25 = vor.u32 %v634_v20, %v615_v22  ;;  %v313_v30 = vld [vmem:[%s873_s19 + $0x10] sm:$0xff] }
  0x1a   : > { %v315_v26 = vpack.c.bf16 %v312_v24, %v311_v23  ;;  %v301_v27 = vld [vmem:[%s285_s22] sm:$0xff]  ;;  %v302_v28 = vld [vmem:[%s285_s22 + $0x8] sm:$0xff]  ;;  %355 = vmatpush.bf16.msra.mxu0 %v594_v16  ;;  %v314_v31 = vld [vmem:[%s873_s19 + $0x18] sm:$0xff] }
  0x1b   : > { %v305_v29 = vpack.c.bf16 %v302_v28, %v301_v27  ;;  %374 = vmatpush.bf16.msra.mxu1 %v598_v17  ;;  %419 = vmatpush.bf16.msra.mxu2 %v614_v21  ;;  %v303_v32 = vld [vmem:[%s285_s22 + $0x10] sm:$0xff]  ;;  %v304_v33 = vld [vmem:[%s285_s22 + $0x18] sm:$0xff]  ;;  %v316_v34 = vpack.c.bf16 %v314_v31, %v313_v30  ;;  %v450_v38 = vld [vmem:[#allocation6] sm:$0x3] }
  0x1c   : > { %438 = vmatpush.bf16.msra.mxu3 %v618_v25  ;;  %v306_v35 = vpack.c.bf16 %v304_v33, %v303_v32  ;;  %v452_v39 = vperm.slane %v450_v38, 0  ;;  %v453_v41 = vperm.slane %v450_v38, 1 }
  0x1d   : > { %607 = vmatmul.msk.bf16.vlgmr.msra.gmra.mxu0 %vm341_vm0, %v315_v26 }
  0x1e   : > { %609 = vmatmul.msk.bf16.vlgmr.msra.gmra.mxu1 %vm341_vm0, %v315_v26  ;;  %627 = vmatmul.msk.bf16.vlgmr.msra.gmra.mxu2 %vm341_vm0, %v305_v29 }
  0x1f   : > { %629 = vmatmul.msk.bf16.vlgmr.msra.gmra.mxu3 %vm341_vm0, %v305_v29 }
  0x2d   : > { %608 = vmatmul.msk.bf16.gmra.mxu0 %vm341_vm0, %v316_v34 }
  0x2e   : > { %610 = vmatmul.msk.bf16.gmra.mxu1 %vm341_vm0, %v316_v34  ;;  %628 = vmatmul.msk.bf16.gmra.mxu2 %vm341_vm0, %v306_v35 }
  0x2f   : > { %630 = vmatmul.msk.bf16.gmra.mxu3 %vm341_vm0, %v306_v35 }
  0x9a   : > { %v357_v36 = vpop.f32.mrf.mxu0 }
  0x9b   : > { %v376_v37 = vpop.f32.mrf.mxu1 }
  0xa1   : > { %v421_v40 = vpop.f32.mrf.mxu2 }
  0xa2   : > { %v422_v42 = vadd.f32 %v421_v40, %v357_v36  ;;  %v440_v43 = vpop.f32.mrf.mxu3  ;;  %v359_v47 = vpop.f32.mrf.mxu0 }
  0xa3   : > { %v441_v44 = vadd.f32 %v440_v43, %v376_v37  ;;  %v378_v48 = vpop.f32.mrf.mxu1 }
  0xa4   : > { %v456_v45 = vadd.f32 %v452_v39, %v422_v42 }
  0xa5   : > { %v457_v46 = vadd.f32 %v453_v41, %v441_v44 }
  0xa6   : > { %464 = vst [vmem:[%s894_s26] sm:$0xff] %v456_v45 }
  0xa7   : > { %465 = vst [vmem:[%s894_s26 + $0x8] sm:$0xff] %v457_v46 }
  0xa9   : > { %v423_v49 = vpop.f32.mrf.mxu2 }
  0xaa   : > { %v424_v50 = vadd.f32 %v423_v49, %v359_v47  ;;  %v442_v51 = vpop.f32.mrf.mxu3  ;;  %v362_v55 = vpop.f32.mrf.mxu0 }
  0xab   : > { %v443_v52 = vadd.f32 %v442_v51, %v378_v48  ;;  %v381_v56 = vpop.f32.mrf.mxu1 }
  0xac   : > { %v458_v53 = vadd.f32 %v452_v39, %v424_v50 }
  0xad   : > { %v459_v54 = vadd.f32 %v453_v41, %v443_v52 }
  0xae   : > { %466 = vst [vmem:[%s894_s26 + $0x10] sm:$0xff] %v458_v53 }
  0xaf   : > { %467 = vst [vmem:[%s894_s26 + $0x18] sm:$0xff] %v459_v54 }
  0xb1   : > { %v426_v57 = vpop.f32.mrf.mxu2 }
  0xb2   : > { %v427_v58 = vadd.f32 %v426_v57, %v362_v55  ;;  %v445_v59 = vpop.f32.mrf.mxu3  ;;  %v364_v63 = vpop.f32.mrf.mxu0 }
  0xb3   : > { %v446_v60 = vadd.f32 %v445_v59, %v381_v56  ;;  %v383_v1 = vpop.f32.mrf.mxu1 }
  0xb4   : > { %v460_v61 = vadd.f32 %v452_v39, %v427_v58 }
  0xb5   : > { %v461_v62 = vadd.f32 %v453_v41, %v446_v60 }
  0xb6   : > { %468 = vst [vmem:[%s894_s26 + $0x20] sm:$0xff] %v460_v61 }
  0xb7   : > { %469 = vst [vmem:[%s894_s26 + $0x28] sm:$0xff] %v461_v62 }
  0xb9   : > { %v428_v0 = vpop.f32.mrf.mxu2 }
  0xba   : > { %v429_v2 = vadd.f32 %v428_v0, %v364_v63  ;;  %v447_v3 = vpop.f32.mrf.mxu3 }
  0xbb   : > { %v448_v4 = vadd.f32 %v447_v3, %v383_v1 }
  0xbc   : > { %v462_v5 = vadd.f32 %v452_v39, %v429_v2 }
  0xbd   : > { %v463_v6 = vadd.f32 %v453_v41, %v448_v4 }
  0xbe   : > { %470 = vst [vmem:[%s894_s26 + $0x30] sm:$0xff] %v462_v5 }
  0xbf   : > { %471 = vst [vmem:[%s894_s26 + $0x38] sm:$0xff] %v463_v6 }
  0xc0 PF: > { %s17_s18 = sadd.s32 1, %s787_s18  }
  0xc1   : > { %p14_p7 = scmp.ge.s32.totalorder %s17_s18, 4  }
  0xc3   :  { %16 = sbr.rel (!%p14_p7) target bundleno = 2 (0x2), region = 86 }
  0xc8   :  { %496 = vsyncpa [#allocation3], 1 }
  0xc9   :  { %498 = vsyncpa [#allocation3 + $0x1], 1 }
  0xca   :  { %499 = vsyncpa [#allocation5], 1 }

// kernel: bilstm_forward.5
= control target key start
LH: loop header
LB: loop body
LE: loop exit
PB: predicated region body
PF: predicated region fallthrough
CT: control target
= control target key end

     0   :  { %s986_s15 = smov 0   ;;  %s1161_s0 = inlined_call_operand.vmem [shape: f32[64,256], index: 0, kind: input, shape index: {}, may-alias: {0,1}]   ;;  %s1162_s1 = inlined_call_operand.vmem [shape: f32[64,256], index: 1, kind: input, shape index: {}, may-alias: {0,1}]   ;;  %s1163_s2 = inlined_call_operand.vmem [shape: f32[64,256], index: 2, kind: input, shape index: {}]   ;;  %s1164_s3 = inlined_call_operand.vmem [shape: f32[64,32], index: 3, kind: output, shape index: {0}]   ;;  %s1165_s4 = inlined_call_operand.vmem [shape: f32[64,32], index: 4, kind: output, shape index: {1}]  }
   0x1 LB: > { %s855_s16 = sadd.s32 4294967295, %s956_s15   ;;  %p859_p0 = scmp.ge.s32.totalorder %s956_s15, 1  ;;  %s956_s15 = sphi %s986_s15, %s15_s15  }
   0x2   : > { %p185_p1 = scmp.lt.s32.totalorder %s956_s15, 3 }
   0x4   : > { %p186_p2 = pnand %p859_p0, %p185_p1 }
   0x5   : > { %s860_s17 = sshll.u32 (!%p186_p2), %s855_s16, 2  ;;  %s232_s18 = ssub.s32 (!%p186_p2), 1, %s855_s16 }
   0x6   : > { %189 = sbr.rel (%p186_p2) target bundleno = 1600 (0x640), region = 32  ;;  %p226_p3 = scmp.lt.s32.totalorder (!%p186_p2), %s860_s17, 7 }
   0x7   : > { %s863_s19 = sshll.u32 (!%p186_p2), %s232_s18, 2  ;;  %p870_p5 = scmp.ne.s32.totalorder (!%p186_p2), %s855_s16, 0 }
   0x8   : > { %p234_p4 = scmp.lt.s32.totalorder (!%p186_p2), %s863_s19, 7 }
   0xb   : > { %s1171_s17 = smov (!%p226_p3, %s860_s17), 7  ;;  %s1173_s19 = smov (!%p234_p4, %s863_s19), 7 }
   0xc   : > { %s889_s20 = sshll.u32 %s1171_s17, 4  ;;  %s867_s21 = sshll.u32 %s1171_s17, 3 }
   0xd   : > { %s997_s24 = scalar_lea.vmem %s1161_s0, %s889_s20  ;;  %s890_s25 = sshll.u32 %s1173_s19, 4 }
   0xe   : > { %s1002_s28 = scalar_lea.vmem %s1162_s1, %s890_s25  ;;  %s1007_s5 = scalar_lea.vmem %s1164_s3, %s867_s21 }
   0xf   : > { %s869_s6 = sshll.u32 %s1173_s19, 3  ;;  %258 = sbr.rel (%p870_p5) target bundleno = 23 (0x17), region = 36 }
  0x10   : > { %s1012_s9 = scalar_lea.vmem %s1165_s4, %s869_s6 }
  0x14   : > { %vm259_vm0 = vcmask 523264   ;;  %v958_v0 = vmov 0.0  }
  0x15   : > { %260 = vst.msk [vmem:[#allocation2] sm:$0xff] %vm259_vm0, %v958_v0 }
  0x16   : > { %261 = vst.msk [vmem:[#allocation3] sm:$0xff] %vm259_vm0, %v958_v0 }
  0x17 PF: > { %v276_v1 = vld [vmem:[%s1163_s2 + $0x70] sm:$0xff]  ;;  %v274_v2 = vld [vmem:[%s1163_s2 + $0x60] sm:$0xff]  ;;  %v277_v3 = vld [vmem:[%s1163_s2 + $0x78] sm:$0xff]  ;;  %s959_s6 = smov 64   ;;  %vm309_vm1 = vcmask 523264   ;;  %v278_v19 = vlaneseq  ;;  %vm417_vm12 = vcmask 261120  }
  0x18   : > { %321 = vmatpush.msra.mxu0 %v276_v1  ;;  %433 = vmatpush.msra.mxu2 %v276_v1  ;;  %v272_v4 = vld [vmem:[%s1163_s2 + $0x50] sm:$0xff]  ;;  %v275_v5 = vld [vmem:[%s1163_s2 + $0x68] sm:$0xff]  ;;  %v273_v6 = vld [vmem:[%s1163_s2 + $0x58] sm:$0xff]  ;;  %s960_s23 = smov 32  }
  0x19   : > { %341 = vmatpush.msra.mxu1 %v277_v3  ;;  %453 = vmatpush.msra.mxu3 %v277_v3  ;;  %v270_v7 = vld [vmem:[%s1163_s2 + $0x40] sm:$0xff]  ;;  %v271_v8 = vld [vmem:[%s1163_s2 + $0x48] sm:$0xff]  ;;  %v268_v10 = vld [vmem:[%s1163_s2 + $0x30] sm:$0xff]  ;;  %v279_v20 = vand.u32 127, %v278_v19 }
  0x1a   : > { %322 = vmatpush.msra.mxu0 %v274_v2  ;;  %434 = vmatpush.msra.mxu2 %v274_v2  ;;  %v269_v11 = vld [vmem:[%s1163_s2 + $0x38] sm:$0xff]  ;;  %v266_v12 = vld [vmem:[%s1163_s2 + $0x20] sm:$0xff]  ;;  %v267_v13 = vld [vmem:[%s1163_s2 + $0x28] sm:$0xff] }
  0x1b   : > { %342 = vmatpush.msra.mxu1 %v275_v5  ;;  %454 = vmatpush.msra.mxu3 %v275_v5  ;;  %v264_v14 = vld [vmem:[%s1163_s2 + $0x10] sm:$0xff]  ;;  %v265_v15 = vld [vmem:[%s1163_s2 + $0x18] sm:$0xff]  ;;  %v262_v16 = vld [vmem:[%s1163_s2] sm:$0xff]  ;;  %v285_v21 = vand.u32 63, %v279_v20  ;;  %v280_v29 = vadd.s32 128, %v279_v20 }
  0x1c   : > { %323 = vmatpush.msra.mxu0 %v272_v4  ;;  %435 = vmatpush.msra.mxu2 %v272_v4  ;;  %v307_v17 = vld [vmem:[#allocation2] sm:$0xff]  ;;  %v263_v18 = vld [vmem:[%s1163_s2 + $0x8] sm:$0xff]  ;;  %v355_v24 = vld [vmem:[%s1002_s28 + $0x30] sm:$0xff] }
  0x1d   : > { %v308_v9 = vld [vmem:[#allocation3] sm:$0xff]  ;;  %343 = vmatpush.msra.mxu1 %v273_v6  ;;  %455 = vmatpush.msra.mxu3 %v273_v6  ;;  %vm1065_vm2 = vcmp.lt.s32.totalorder %v285_v21, 32  ;;  %v353_v23 = vld [vmem:[%s997_s24] sm:$0xff]  ;;  %v292_v30 = vand.u32 63, %v280_v29  ;;  %v356_v35 = vld [vmem:[%s1002_s28 + $0x38] sm:$0xff] }
  0x1e   : > { %401 = vrot.lane.b32.xlu0 %v308_v9, %s959_s6  ;;  %324 = vmatpush.msra.mxu0 %v270_v7  ;;  %v357_v25 = vsel %vm1065_vm2, %v353_v23, %v355_v24  ;;  %v354_v34 = vld [vmem:[%s997_s24 + $0x8] sm:$0xff] }
  0x1f   : > { %344 = vmatpush.msra.mxu1 %v271_v8  ;;  %436 = vmatpush.msra.mxu2 %v270_v7  ;;  %vm1073_vm3 = vcmp.lt.s32.totalorder %v292_v30, 32 }
  0x20   : > { %325 = vmatpush.msra.mxu0 %v268_v10  ;;  %456 = vmatpush.msra.mxu3 %v271_v8  ;;  %v358_v37 = vsel %vm1073_vm3, %v354_v34, %v356_v35 }
  0x21   : > { %345 = vmatpush.msra.mxu1 %v269_v11  ;;  %437 = vmatpush.msra.mxu2 %v268_v10 }
  0x22   : > { %326 = vmatpush.msra.mxu0 %v266_v12  ;;  %457 = vmatpush.msra.mxu3 %v269_v11 }
  0x23   : > { %346 = vmatpush.msra.mxu1 %v267_v13  ;;  %438 = vmatpush.msra.mxu2 %v266_v12 }
  0x24   : > { %327 = vmatpush.msra.mxu0 %v264_v14  ;;  %458 = vmatpush.msra.mxu3 %v267_v13 }
  0x25   : > { %347 = vmatpush.msra.mxu1 %v265_v15  ;;  %439 = vmatpush.msra.mxu2 %v264_v14 }
  0x26   : > { %328 = vmatpush.msra.mxu0 %v262_v16  ;;  %459 = vmatpush.msra.mxu3 %v265_v15 }
  0x27   : > { %871 = vmatmul.msk.f32.vlgmr.msra.gmra.mxu0 %vm309_vm1, %v307_v17  ;;  %348 = vmatpush.msra.mxu1 %v263_v18 }
  0x28   : > { %872 = vmatmul.msk.f32.vlgmr.msra.gmra.mxu1 %vm309_vm1, %v307_v17  ;;  %440 = vmatpush.msra.mxu2 %v262_v16 }
  0x29   : > { %460 = vmatpush.msra.mxu3 %v263_v18  ;;  %540 = vmatpush.msrb.mxu0 %v276_v1 }
  0x2a   : > { %560 = vmatpush.msrb.mxu1 %v277_v3  ;;  %647 = vmatpush.msrb.mxu2 %v276_v1 }
  0x2b   : > { %541 = vmatpush.msrb.mxu0 %v274_v2  ;;  %667 = vmatpush.msrb.mxu3 %v277_v3 }
  0x2c   : > { %561 = vmatpush.msrb.mxu1 %v275_v5  ;;  %648 = vmatpush.msrb.mxu2 %v274_v2 }
  0x2d   : > { %542 = vmatpush.msrb.mxu0 %v272_v4  ;;  %668 = vmatpush.msrb.mxu3 %v275_v5 }
  0x2e   : > { %562 = vmatpush.msrb.mxu1 %v273_v6  ;;  %649 = vmatpush.msrb.mxu2 %v272_v4 }
  0x2f   : > { %543 = vmatpush.msrb.mxu0 %v270_v7  ;;  %669 = vmatpush.msrb.mxu3 %v273_v6 }
  0x30   : > { %563 = vmatpush.msrb.mxu1 %v271_v8  ;;  %650 = vmatpush.msrb.mxu2 %v270_v7  ;;  %v465_v7 = vld [vmem:[%s997_s24 + $0x10] sm:$0xff] }
  0x31   : > { %544 = vmatpush.msrb.mxu0 %v268_v10  ;;  %670 = vmatpush.msrb.mxu3 %v271_v8  ;;  %v467_v8 = vld [vmem:[%s1002_s28 + $0x20] sm:$0xff] }
  0x32   : > { %564 = vmatpush.msrb.mxu1 %v269_v11  ;;  %651 = vmatpush.msrb.mxu2 %v268_v10  ;;  %v469_v9 = vsel %vm1065_vm2, %v465_v7, %v467_v8 }
  0x33   : > { %545 = vmatpush.msrb.mxu0 %v266_v12  ;;  %671 = vmatpush.msrb.mxu3 %v269_v11 }
  0x34   : > { %565 = vmatpush.msrb.mxu1 %v267_v13  ;;  %652 = vmatpush.msrb.mxu2 %v266_v12 }
  0x35   : > { %546 = vmatpush.msrb.mxu0 %v264_v14  ;;  %672 = vmatpush.msrb.mxu3 %v267_v13 }
  0x36   : > { %566 = vmatpush.msrb.mxu1 %v265_v15  ;;  %653 = vmatpush.msrb.mxu2 %v264_v14 }
  0x37   : > { %547 = vmatpush.msrb.mxu0 %v262_v16  ;;  %673 = vmatpush.msrb.mxu3 %v265_v15  ;;  %v466_v15 = vld [vmem:[%s997_s24 + $0x18] sm:$0xff] }
  0x38   : > { %567 = vmatpush.msrb.mxu1 %v263_v18  ;;  %654 = vmatpush.msrb.mxu2 %v262_v16  ;;  %v468_v16 = vld [vmem:[%s1002_s28 + $0x28] sm:$0xff] }
  0x39   : > { %674 = vmatpush.msrb.mxu3 %v263_v18  ;;  %v470_v18 = vsel %vm1073_vm3, %v466_v15, %v468_v16 }
  0x90   : > { %v402_v56 = vpop.permute.xlu0 %401 }
  0xa4   : > { %v330_v26 = vpop.f32.mrf.mxu0 }
  0xa5   : > { %v359_v27 = vadd.f32 %v357_v25, %v330_v26  ;;  %v350_v36 = vpop.f32.mrf.mxu1 }
  0xa6   : > { %v360_v39 = vadd.f32 %v358_v37, %v350_v36 }
  0xa7   : > { %v873_v28 = vmul.f32 -1.442695, %v359_v27 }
  0xa8   : > { %v874_v51 = vmul.f32 -1.442695, %v360_v39 }
  0xa9   : > { %902 = vpow2.f32 %v873_v28 }
  0xaf   : > { %v903_v31 = vpop.eup %902 }
  0xb0   : > { %v364_v32 = vadd.f32 1.0, %v903_v31 }
  0xb2   : > { %904 = vrcp.f32 %v364_v32  ;;  %v376_v42 = vand.u32 2147483648, %v364_v32  ;;  %v374_v44 = vand.u32 2147483647, %v364_v32  ;;  %vm370_vm5 = vweird.f32 %v364_v32 }
  0xb3   : > { %906 = vtanh.f32 %v360_v39 }
  0xb4   : > { %v377_v47 = vor.u32 1.1754944e-38, %v376_v42  ;;  %vm375_vm7 = vcmp.eq.f32.partialorder %v374_v44, 8.507059e+37  ;;  %908 = vpow2.f32 %v874_v51 }
  0xb8   : > { %v905_v38 = vpop.eup %904 }
  0xb9   : > { %v366_v40 = vmul.f32 %v905_v38, %v364_v32  ;;  %vm371_vm4 = vweird.f32 %v905_v38  ;;  %v907_v46 = vpop.eup %906 }
  0xba   : > { %vm372_vm6 = vmor %vm370_vm5, %vm371_vm4  ;;  %v909_v52 = vpop.eup %908 }
  0xbb   : > { %v367_v41 = vsub.f32 1.0, %v366_v40  ;;  %v384_v53 = vadd.f32 1.0, %v909_v52 }
  0xbd   : > { %v368_v43 = vmul.f32 %v905_v38, %v367_v41  ;;  %910 = vrcp.f32 %v384_v53  ;;  %vm390_vm8 = vweird.f32 %v384_v53  ;;  %v396_v62 = vand.u32 2147483648, %v384_v53 }
  0xbe   : > { %v394_v0 = vand.u32 2147483647, %v384_v53 }
  0xbf   : > { %v369_v45 = vadd.f32 %v905_v38, %v368_v43  ;;  %v397_v1 = vor.u32 1.1754944e-38, %v396_v62  ;;  %v575_v62 = vld [vmem:[%s1002_s28 + $0x18] sm:$0xff] }
  0xc0   : > { %vm395_vm11 = vcmp.eq.f32.partialorder %v394_v0, 8.507059e+37 }
  0xc1   : > { %v373_v48 = vsel %vm372_vm6, %v905_v38, %v369_v45 }
  0xc2   : > { %v378_v49 = vsel %vm375_vm7, %v377_v47, %v373_v48 }
  0xc3   : > { %v405_v50 = vmul.f32 %v907_v46, %v378_v49  ;;  %v911_v54 = vpop.eup %910  ;;  %v404_v59 = vmul.f32 %v402_v56, %v378_v49 }
  0xc4   : > { %v386_v55 = vmul.f32 %v911_v54, %v384_v53  ;;  %vm391_vm9 = vweird.f32 %v911_v54  ;;  %v572_v53 = vld [vmem:[%s997_s24 + $0x20] sm:$0xff] }
  0xc5   : > { %407 = vrot.lane.b32.xlu0 %v405_v50, %s959_s6  ;;  %vm392_vm10 = vmor %vm390_vm8, %vm391_vm9 }
  0xc6   : > { %v387_v57 = vsub.f32 1.0, %v386_v55 }
  0xc8   : > { %v388_v58 = vmul.f32 %v911_v54, %v387_v57 }
  0xca   : > { %v389_v63 = vadd.f32 %v911_v54, %v388_v58 }
  0xcc   : > { %v393_v2 = vsel %vm392_vm10, %v911_v54, %v389_v63  ;;  %v574_v54 = vld [vmem:[%s1002_s28 + $0x10] sm:$0xff] }
  0xcd   : > { %v398_v4 = vsel %vm395_vm11, %v397_v1, %v393_v2  ;;  %v576_v55 = vsel %vm1065_vm2, %v572_v53, %v574_v54 }
 0x137   : > { %v408_v60 = vpop.permute.xlu0 %407 }
 0x138   : > { %v410_v61 = vadd.f32 %v408_v60, %v404_v59 }
 0x13a   : > { %912 = vtanh.f32 %v410_v61 }
 0x140   : > { %v913_v3 = vpop.eup %912 }
 0x141   : > { %v1082_v5 = vmul.f32 %v913_v3, %v398_v4 }
 0x143   : > { %414 = vrot.lane.b32.xlu1 %v1082_v5, %s959_s6 }
 0x1b5   : > { %v415_v6 = vpop.permute.xlu1 %414 }
 0x1b6   : > { %418 = vst.msk [vmem:[%s1007_s5] sm:$0xff] %vm417_vm12, %v415_v6  ;;  %875 = vmatmul.msk.f32.vlgmr.msra.gmra.mxu2 %vm309_vm1, %v415_v6  ;;  %876 = vmatmul.msk.f32.vlgmr.msra.gmra.mxu3 %vm309_vm1, %v415_v6 }
 0x239   : > { %v442_v10 = vpop.f32.mrf.mxu2  ;;  %v462_v17 = vpop.f32.mrf.mxu3 }
 0x23a   : > { %v471_v11 = vadd.f32 %v469_v9, %v442_v10  ;;  %v472_v20 = vadd.f32 %v470_v18, %v462_v17 }
 0x23c   : > { %v877_v12 = vmul.f32 -1.442695, %v471_v11  ;;  %v878_v34 = vmul.f32 -1.442695, %v472_v20 }
 0x23e   : > { %914 = vpow2.f32 %v877_v12 }
 0x244   : > { %v915_v13 = vpop.eup %914 }
 0x245   : > { %v476_v14 = vadd.f32 1.0, %v915_v13 }
 0x247   : > { %916 = vrcp.f32 %v476_v14  ;;  %v488_v24 = vand.u32 2147483648, %v476_v14  ;;  %v486_v26 = vand.u32 2147483647, %v476_v14  ;;  %vm482_vm14 = vweird.f32 %v476_v14 }
 0x248   : > { %918 = vtanh.f32 %v472_v20 }
 0x249   : > { %v489_v28 = vor.u32 1.1754944e-38, %v488_v24  ;;  %vm487_vm0 = vcmp.eq.f32.partialorder %v486_v26, 8.507059e+37  ;;  %920 = vpow2.f32 %v878_v34 }
 0x24d   : > { %v917_v19 = vpop.eup %916 }
 0x24e   : > { %v478_v21 = vmul.f32 %v917_v19, %v476_v14  ;;  %vm483_vm13 = vweird.f32 %v917_v19  ;;  %v919_v30 = vpop.eup %918 }
 0x24f   : > { %vm484_vm15 = vmor %vm482_vm14, %vm483_vm13  ;;  %v921_v35 = vpop.eup %920 }
 0x250   : > { %v479_v23 = vsub.f32 1.0, %v478_v21  ;;  %v496_v36 = vadd.f32 1.0, %v921_v35 }
 0x252   : > { %v480_v25 = vmul.f32 %v917_v19, %v479_v23  ;;  %922 = vrcp.f32 %v496_v36  ;;  %v508_v45 = vand.u32 2147483648, %v496_v36  ;;  %vm502_vm5 = vweird.f32 %v496_v36 }
 0x253   : > { %v506_v46 = vand.u32 2147483647, %v496_v36 }
 0x254   : > { %v481_v27 = vadd.f32 %v917_v19, %v480_v25  ;;  %v509_v48 = vor.u32 1.1754944e-38, %v508_v45  ;;  %v680_v45 = vld [vmem:[%s997_s24 + $0x38] sm:$0xff] }
 0x255   : > { %vm507_vm7 = vcmp.eq.f32.partialorder %v506_v46, 8.507059e+37  ;;  %v682_v46 = vld [vmem:[%s1002_s28 + $0x8] sm:$0xff] }
 0x256   : > { %v485_v29 = vsel %vm484_vm15, %v917_v19, %v481_v27 }
 0x257   : > { %v490_v31 = vsel %vm487_vm0, %v489_v28, %v485_v29 }
 0x258   : > { %v513_v32 = vmul.f32 %v919_v30, %v490_v31  ;;  %v923_v37 = vpop.eup %922  ;;  %v512_v41 = vmul.f32 %v490_v31, %v410_v61  ;;  %v573_v61 = vld [vmem:[%s997_s24 + $0x28] sm:$0xff] }
 0x259   : > { %v498_v38 = vmul.f32 %v923_v37, %v496_v36  ;;  %vm503_vm4 = vweird.f32 %v923_v37  ;;  %v577_v0 = vsel %vm1073_vm3, %v573_v61, %v575_v62 }
 0x25a   : > { %515 = vrot.lane.b32.xlu1 %v513_v32, %s959_s6  ;;  %vm504_vm6 = vmor %vm502_vm5, %vm503_vm4 }
 0x25b   : > { %v499_v39 = vsub.f32 1.0, %v498_v38  ;;  %v681_v38 = vld [vmem:[%s1002_s28] sm:$0xff] }
 0x25d   : > { %v500_v40 = vmul.f32 %v923_v37, %v499_v39 }
 0x25f   : > { %v501_v44 = vadd.f32 %v923_v37, %v500_v40 }
 0x261   : > { %v505_v47 = vsel %vm504_vm6, %v923_v37, %v501_v44  ;;  %v679_v37 = vld [vmem:[%s997_s24 + $0x30] sm:$0xff] }
 0x262   : > { %v510_v50 = vsel %vm507_vm7, %v509_v48, %v505_v47  ;;  %v683_v39 = vsel %vm1065_vm2, %v679_v37, %v681_v38  ;;  %v684_v48 = vsel %vm1073_vm3, %v680_v45, %v682_v46 }
 0x2cc   : > { %v516_v42 = vpop.permute.xlu1 %515 }
 0x2cd   : > { %v1099_v43 = vadd.f32 %v516_v42, %v512_v41 }
 0x2cf   : > { %924 = vtanh.f32 %v1099_v43 }
 0x2d5   : > { %v925_v49 = vpop.eup %924 }
 0x2d6   : > { %v1102_v51 = vmul.f32 %v925_v49, %v510_v50 }
 0x2d8   : > { %522 = vrot.lane.b32.xlu2 %v1102_v51, %s959_s6 }
 0x332   : > { %v523_v52 = vpop.permute.xlu2 %522 }
 0x333   : > { %525 = vst.msk [vmem:[%s1007_s5 + $0x8] sm:$0xff] %vm417_vm12, %v523_v52  ;;  %879 = vmatmul.msk.f32.vlgmr.msrb.gmra.mxu0 %vm309_vm1, %v523_v52  ;;  %880 = vmatmul.msk.f32.vlgmr.msrb.gmra.mxu1 %vm309_vm1, %v523_v52 }
 0x3b0   : > { %v549_v56 = vpop.f32.mrf.mxu0  ;;  %v569_v63 = vpop.f32.mrf.mxu1 }
 0x3b1   : > { %v578_v57 = vadd.f32 %v576_v55, %v549_v56  ;;  %v579_v2 = vadd.f32 %v577_v0, %v569_v63 }
 0x3b3   : > { %v881_v58 = vmul.f32 -1.442695, %v578_v57  ;;  %v882_v15 = vmul.f32 -1.442695, %v579_v2 }
 0x3b5   : > { %926 = vpow2.f32 %v881_v58 }
 0x3bb   : > { %v927_v59 = vpop.eup %926 }
 0x3bc   : > { %v583_v60 = vadd.f32 1.0, %v927_v59 }
 0x3be   : > { %928 = vrcp.f32 %v583_v60  ;;  %v595_v6 = vand.u32 2147483648, %v583_v60  ;;  %v593_v8 = vand.u32 2147483647, %v583_v60  ;;  %vm589_vm9 = vweird.f32 %v583_v60 }
 0x3bf   : > { %930 = vtanh.f32 %v579_v2 }
 0x3c0   : > { %v596_v10 = vor.u32 1.1754944e-38, %v595_v6  ;;  %vm594_vm11 = vcmp.eq.f32.partialorder %v593_v8, 8.507059e+37  ;;  %932 = vpow2.f32 %v882_v15 }
 0x3c4   : > { %v929_v1 = vpop.eup %928 }
 0x3c5   : > { %v585_v3 = vmul.f32 %v929_v1, %v583_v60  ;;  %vm590_vm8 = vweird.f32 %v929_v1  ;;  %v931_v12 = vpop.eup %930 }
 0x3c6   : > { %vm591_vm10 = vmor %vm589_vm9, %vm590_vm8  ;;  %v933_v16 = vpop.eup %932 }
 0x3c7   : > { %v586_v4 = vsub.f32 1.0, %v585_v3  ;;  %v603_v17 = vadd.f32 1.0, %v933_v16 }
 0x3c9   : > { %v587_v7 = vmul.f32 %v929_v1, %v586_v4  ;;  %934 = vrcp.f32 %v603_v17  ;;  %vm609_vm14 = vweird.f32 %v603_v17  ;;  %v613_v27 = vand.u32 2147483647, %v603_v17 }
 0x3cb   : > { %v588_v9 = vadd.f32 %v929_v1, %v587_v7  ;;  %vm614_vm0 = vcmp.eq.f32.partialorder %v613_v27, 8.507059e+37 }
 0x3cd   : > { %v592_v11 = vsel %vm591_vm10, %v929_v1, %v588_v9 }
 0x3ce   : > { %v597_v13 = vsel %vm594_vm11, %v596_v10, %v592_v11 }
 0x3cf   : > { %v620_v14 = vmul.f32 %v931_v12, %v597_v13  ;;  %v935_v18 = vpop.eup %934  ;;  %v619_v23 = vmul.f32 %v597_v13, %v1099_v43 }
 0x3d0   : > { %v605_v19 = vmul.f32 %v935_v18, %v603_v17  ;;  %vm610_vm13 = vweird.f32 %v935_v18 }
 0x3d1   : > { %622 = vrot.lane.b32.xlu2 %v620_v14, %s959_s6  ;;  %vm611_vm15 = vmor %vm609_vm14, %vm610_vm13 }
 0x3d2   : > { %v606_v20 = vsub.f32 1.0, %v605_v19 }
 0x3d4   : > { %v607_v21 = vmul.f32 %v935_v18, %v606_v20 }
 0x3d6   : > { %v608_v26 = vadd.f32 %v935_v18, %v607_v21 }
 0x3d8   : > { %v612_v28 = vsel %vm611_vm15, %v935_v18, %v608_v26 }
 0x3d9   : > { %419 = vrot.lane.b32.xlu2 %v1082_v5, %s960_s23  ;;  %v615_v5 = vand.u32 2147483648, %v603_v17 }
 0x3db   : > { %v616_v29 = vor.u32 1.1754944e-38, %v615_v5 }
 0x3dd   : > { %v617_v32 = vsel %vm614_vm0, %v616_v29, %v612_v28 }
 0x42b   : > { %v623_v24 = vpop.permute.xlu2 %622 }
 0x42c   : > { %v1122_v25 = vadd.f32 %v623_v24, %v619_v23 }
 0x42e   : > { %936 = vtanh.f32 %v1122_v25 }
 0x433   : > { %v420_v30 = vpop.permute.xlu2 %419 }
 0x434   : > { %v937_v31 = vpop.eup %936  ;;  %422 = vst.msk [vmem:[%s1012_s9 + $0x18] sm:$0xff] %vm417_vm12, %v420_v30 }
 0x435   : > { %v627_v34 = vmul.f32 %v937_v31, %v617_v32 }
 0x437   : > { %629 = vrot.lane.b32.xlu0 %v627_v34, %s959_s6 }
 0x43f   : > { %526 = vrot.lane.b32.xlu0 %v1102_v51, %s960_s23 }
 0x4a9   : > { %v630_v35 = vpop.permute.xlu0 %629 }
 0x4aa   : > { %632 = vst.msk [vmem:[%s1007_s5 + $0x10] sm:$0xff] %vm417_vm12, %v630_v35  ;;  %883 = vmatmul.msk.f32.vlgmr.msrb.gmra.mxu2 %vm309_vm1, %v630_v35  ;;  %884 = vmatmul.msk.f32.vlgmr.msrb.gmra.mxu3 %vm309_vm1, %v630_v35 }
 0x4b1   : > { %v527_v36 = vpop.permute.xlu0 %526 }
 0x4b2   : > { %529 = vst.msk [vmem:[%s1012_s9 + $0x10] sm:$0xff] %vm417_vm12, %v527_v36 }
 0x52d   : > { %v656_v40 = vpop.f32.mrf.mxu2  ;;  %v676_v47 = vpop.f32.mrf.mxu3 }
 0x52e   : > { %v685_v41 = vadd.f32 %v683_v39, %v656_v40  ;;  %v686_v50 = vadd.f32 %v684_v48, %v676_v47 }
 0x530   : > { %v885_v42 = vmul.f32 -1.442695, %v685_v41  ;;  %v886_v33 = vmul.f32 -1.442695, %v686_v50 }
 0x532   : > { %938 = vpow2.f32 %v885_v42 }
 0x538   : > { %v939_v43 = vpop.eup %938 }
 0x539   : > { %v690_v44 = vadd.f32 1.0, %v939_v43 }
 0x53b   : > { %940 = vrcp.f32 %v690_v44  ;;  %v702_v22 = vand.u32 2147483648, %v690_v44  ;;  %v700_v54 = vand.u32 2147483647, %v690_v44  ;;  %vm696_vm4 = vweird.f32 %v690_v44 }
 0x53c   : > { %942 = vtanh.f32 %v686_v50 }
 0x53d   : > { %v703_v56 = vor.u32 1.1754944e-38, %v702_v22  ;;  %vm701_vm6 = vcmp.eq.f32.partialorder %v700_v54, 8.507059e+37  ;;  %944 = vpow2.f32 %v886_v33 }
 0x541   : > { %v941_v49 = vpop.eup %940 }
 0x542   : > { %v692_v51 = vmul.f32 %v941_v49, %v690_v44  ;;  %vm697_vm2 = vweird.f32 %v941_v49  ;;  %v943_v58 = vpop.eup %942 }
 0x543   : > { %vm698_vm5 = vmor %vm696_vm4, %vm697_vm2  ;;  %v945_v61 = vpop.eup %944 }
 0x544   : > { %v693_v52 = vsub.f32 1.0, %v692_v51  ;;  %v710_v62 = vadd.f32 1.0, %v945_v61 }
 0x546   : > { %v694_v53 = vmul.f32 %v941_v49, %v693_v52  ;;  %946 = vrcp.f32 %v710_v62  ;;  %v722_v8 = vand.u32 2147483648, %v710_v62  ;;  %vm716_vm7 = vweird.f32 %v710_v62 }
 0x547   : > { %v720_v9 = vand.u32 2147483647, %v710_v62 }
 0x548   : > { %v695_v55 = vadd.f32 %v941_v49, %v694_v53  ;;  %v723_v11 = vor.u32 1.1754944e-38, %v722_v8 }
 0x549   : > { %vm721_vm9 = vcmp.eq.f32.partialorder %v720_v9, 8.507059e+37 }
 0x54a   : > { %v699_v57 = vsel %vm698_vm5, %v941_v49, %v695_v55 }
 0x54b   : > { %v704_v59 = vsel %vm701_vm6, %v703_v56, %v699_v57 }
 0x54c   : > { %v727_v60 = vmul.f32 %v943_v58, %v704_v59  ;;  %v947_v63 = vpop.eup %946  ;;  %v726_v3 = vmul.f32 %v704_v59, %v1122_v25 }
 0x54d   : > { %v712_v0 = vmul.f32 %v947_v63, %v710_v62  ;;  %vm717_vm3 = vweird.f32 %v947_v63 }
 0x54e   : > { %729 = vrot.lane.b32.xlu1 %v727_v60, %s959_s6  ;;  %vm718_vm8 = vmor %vm716_vm7, %vm717_vm3 }
 0x54f   : > { %v713_v1 = vsub.f32 1.0, %v712_v0 }
 0x551   : > { %v714_v2 = vmul.f32 %v947_v63, %v713_v1 }
 0x553   : > { %v715_v7 = vadd.f32 %v947_v63, %v714_v2 }
 0x555   : > { %v719_v10 = vsel %vm718_vm8, %v947_v63, %v715_v7 }
 0x556   : > { %633 = vrot.lane.b32.xlu1 %v627_v34, %s960_s23  ;;  %v724_v14 = vsel %vm721_vm9, %v723_v11, %v719_v10 }
 0x5c0   : > { %v730_v4 = vpop.permute.xlu1 %729 }
 0x5c1   : > { %v732_v6 = vadd.f32 %v730_v4, %v726_v3 }
 0x5c3   : > { %948 = vtanh.f32 %v732_v6  ;;  %746 = vrot.lane.b32.xlu1 %v732_v6, %s959_s6 }
 0x5c8   : > { %v634_v12 = vpop.permute.xlu1 %633 }
 0x5c9   : > { %v949_v13 = vpop.eup %948  ;;  %636 = vst.msk [vmem:[%s1012_s9 + $0x8] sm:$0xff] %vm417_vm12, %v634_v12 }
 0x5ca   : > { %v734_v15 = vmul.f32 %v949_v13, %v724_v14 }
 0x5cc   : > { %740 = vrot.lane.b32.xlu0 %v734_v15, %s960_s23  ;;  %736 = vrot.lane.b32.xlu2 %v734_v15, %s959_s6 }
 0x626   : > { %v737_v16 = vpop.permute.xlu2 %736 }
 0x627   : > { %739 = vst.msk [vmem:[%s1007_s5 + $0x18] sm:$0xff] %vm417_vm12, %v737_v16 }
 0x628   : > { %744 = vst.msk [vmem:[#allocation2] sm:$0xff] %vm309_vm1, %v737_v16 }
 0x635   : > { %v747_v17 = vpop.permute.xlu1 %746 }
 0x636   : > { %749 = vst.msk [vmem:[#allocation3] sm:$0xff] %vm309_vm1, %v747_v17 }
 0x63e   : > { %v741_v18 = vpop.permute.xlu0 %740 }
 0x63f   : > { %743 = vst.msk [vmem:[%s1012_s9] sm:$0xff] %vm417_vm12, %v741_v18 }
 0x640 PF: > { %s15_s15 = sadd.s32 1, %s956_s15  }
 0x641   : > { %p12_p6 = scmp.ge.s32.totalorder %s15_s15, 4  }
 0x643   :  { %14 = sbr.rel (!%p12_p6) target bundleno = 1 (0x1), region = 81 }

// kernel: bilstm_forward.7
= control target key start
LH: loop header
LB: loop body
LE: loop exit
PB: predicated region body
PF: predicated region fallthrough
CT: control target
= control target key end

     0   :  { %s999_s21 = smov 0   ;;  %s1178_s0 = inlined_call_operand.vmem [shape: f32[64,256], index: 0, kind: input, shape index: {}, may-alias: {0,1}]   ;;  %s1179_s1 = inlined_call_operand.vmem [shape: f32[64,256], index: 1, kind: input, shape index: {}, may-alias: {0,1}]   ;;  %s1180_s2 = inlined_call_operand.vmem [shape: f32[64,256], index: 2, kind: input, shape index: {}]   ;;  %s1181_s3 = inlined_call_operand.vmem [shape: f32[32,5], index: 3, kind: input, shape index: {}]   ;;  %s1182_s4 = inlined_call_operand.vmem [shape: f32[32,5], index: 4, kind: input, shape index: {}]   ;;  %s1183_s5 = inlined_call_operand.vmem [shape: f32[1,5], index: 5, kind: input, shape index: {}]   ;;  %s1184_s6 = inlined_call_operand.vmem [shape: f32[8,5], index: 6, kind: output, shape index: {}]  }
   0x1 LB: > { %s1005_s22 = sadd.s32 4294967295, %s959_s21   ;;  %p861_p0 = scmp.ge.s32.totalorder %s959_s21, 1  ;;  %s959_s21 = sphi %s999_s21, %s16_s21  }
   0x2   : > { %p225_p1 = scmp.lt.s32.totalorder %s959_s21, 3 }
   0x4   : > { %p226_p2 = pnand %p861_p0, %p225_p1 }
   0x5   : > { %s862_s23 = sshll.u32 (!%p226_p2), %s1005_s22, 2  ;;  %s265_s24 = ssub.s32 (!%p226_p2), 1, %s1005_s22 }
   0x6   : > { %229 = sbr.rel (%p226_p2) target bundleno = 1978 (0x7ba), region = 44  ;;  %p259_p3 = scmp.lt.s32.totalorder (!%p226_p2), %s862_s23, 7 }
   0x7   : > { %s865_s25 = sshll.u32 (!%p226_p2), %s265_s24, 2  ;;  %p868_p5 = scmp.ne.s32.totalorder (!%p226_p2), %s1005_s22, 0 }
   0x8   : > { %p267_p4 = scmp.lt.s32.totalorder (!%p226_p2), %s865_s25, 7 }
   0xb   : > { %s1190_s23 = smov (!%p259_p3, %s862_s23), 7  ;;  %s1192_s25 = smov (!%p267_p4, %s865_s25), 7 }
   0xc   : > { %s891_s26 = sshll.u32 %s1190_s23, 4  ;;  %s892_s30 = sshll.u32 %s1192_s25, 4 }
   0xd   : > { %s1014_s29 = scalar_lea.vmem %s1178_s0, %s891_s26  ;;  %s1019_s9 = scalar_lea.vmem %s1179_s1, %s892_s30 }
   0xe   : > { %277 = sbr.rel (%p868_p5) target bundleno = 22 (0x16), region = 48 }
  0x13   : > { %vm278_vm0 = vcmask 523264   ;;  %v961_v0 = vmov 0.0  }
  0x14   : > { %279 = vst.msk [vmem:[#allocation2] sm:$0xff] %vm278_vm0, %v961_v0 }
  0x15   : > { %280 = vst.msk [vmem:[#allocation3] sm:$0xff] %vm278_vm0, %v961_v0 }
  0x16 PF: > { %v295_v1 = vld [vmem:[%s1180_s2 + $0x70] sm:$0xff]  ;;  %v293_v2 = vld [vmem:[%s1180_s2 + $0x60] sm:$0xff]  ;;  %v296_v3 = vld [vmem:[%s1180_s2 + $0x78] sm:$0xff]  ;;  %s962_s7 = smov 64   ;;  %vm328_vm1 = vcmask 523264   ;;  %v297_v19 = vlaneseq  ;;  %s963_s27 = smov (!%p868_p5), 32  }
  0x17   : > { %340 = vmatpush.msra.mxu0 %v295_v1  ;;  %445 = vmatpush.msra.mxu2 %v295_v1  ;;  %v291_v4 = vld [vmem:[%s1180_s2 + $0x50] sm:$0xff]  ;;  %v294_v5 = vld [vmem:[%s1180_s2 + $0x68] sm:$0xff]  ;;  %v292_v6 = vld [vmem:[%s1180_s2 + $0x58] sm:$0xff] }
  0x18   : > { %360 = vmatpush.msra.mxu1 %v296_v3  ;;  %465 = vmatpush.msra.mxu3 %v296_v3  ;;  %v289_v7 = vld [vmem:[%s1180_s2 + $0x40] sm:$0xff]  ;;  %v290_v8 = vld [vmem:[%s1180_s2 + $0x48] sm:$0xff]  ;;  %v287_v10 = vld [vmem:[%s1180_s2 + $0x30] sm:$0xff]  ;;  %v298_v20 = vand.u32 127, %v297_v19 }
  0x19   : > { %341 = vmatpush.msra.mxu0 %v293_v2  ;;  %446 = vmatpush.msra.mxu2 %v293_v2  ;;  %v288_v11 = vld [vmem:[%s1180_s2 + $0x38] sm:$0xff]  ;;  %v285_v12 = vld [vmem:[%s1180_s2 + $0x20] sm:$0xff]  ;;  %v286_v13 = vld [vmem:[%s1180_s2 + $0x28] sm:$0xff] }
  0x1a   : > { %361 = vmatpush.msra.mxu1 %v294_v5  ;;  %466 = vmatpush.msra.mxu3 %v294_v5  ;;  %v283_v14 = vld [vmem:[%s1180_s2 + $0x10] sm:$0xff]  ;;  %v284_v15 = vld [vmem:[%s1180_s2 + $0x18] sm:$0xff]  ;;  %v281_v16 = vld [vmem:[%s1180_s2] sm:$0xff]  ;;  %v304_v21 = vand.u32 63, %v298_v20  ;;  %v299_v29 = vadd.s32 128, %v298_v20 }
  0x1b   : > { %342 = vmatpush.msra.mxu0 %v291_v4  ;;  %447 = vmatpush.msra.mxu2 %v291_v4  ;;  %v326_v17 = vld [vmem:[#allocation2] sm:$0xff]  ;;  %v282_v18 = vld [vmem:[%s1180_s2 + $0x8] sm:$0xff]  ;;  %v374_v24 = vld [vmem:[%s1019_s9 + $0x30] sm:$0xff] }
  0x1c   : > { %v327_v9 = vld [vmem:[#allocation3] sm:$0xff]  ;;  %362 = vmatpush.msra.mxu1 %v292_v6  ;;  %467 = vmatpush.msra.mxu3 %v292_v6  ;;  %vm1075_vm2 = vcmp.lt.s32.totalorder %v304_v21, 32  ;;  %v372_v23 = vld [vmem:[%s1014_s29] sm:$0xff]  ;;  %v311_v30 = vand.u32 63, %v299_v29  ;;  %v375_v35 = vld [vmem:[%s1019_s9 + $0x38] sm:$0xff] }
  0x1d   : > { %420 = vrot.lane.b32.xlu0 %v327_v9, %s962_s7  ;;  %343 = vmatpush.msra.mxu0 %v289_v7  ;;  %v376_v25 = vsel %vm1075_vm2, %v372_v23, %v374_v24  ;;  %v373_v34 = vld [vmem:[%s1014_s29 + $0x8] sm:$0xff] }
  0x1e   : > { %363 = vmatpush.msra.mxu1 %v290_v8  ;;  %448 = vmatpush.msra.mxu2 %v289_v7  ;;  %vm1083_vm3 = vcmp.lt.s32.totalorder %v311_v30, 32 }
  0x1f   : > { %344 = vmatpush.msra.mxu0 %v287_v10  ;;  %468 = vmatpush.msra.mxu3 %v290_v8  ;;  %v377_v37 = vsel %vm1083_vm3, %v373_v34, %v375_v35 }
  0x20   : > { %364 = vmatpush.msra.mxu1 %v288_v11  ;;  %449 = vmatpush.msra.mxu2 %v287_v10 }
  0x21   : > { %345 = vmatpush.msra.mxu0 %v285_v12  ;;  %469 = vmatpush.msra.mxu3 %v288_v11 }
  0x22   : > { %365 = vmatpush.msra.mxu1 %v286_v13  ;;  %450 = vmatpush.msra.mxu2 %v285_v12 }
  0x23   : > { %346 = vmatpush.msra.mxu0 %v283_v14  ;;  %470 = vmatpush.msra.mxu3 %v286_v13 }
  0x24   : > { %366 = vmatpush.msra.mxu1 %v284_v15  ;;  %451 = vmatpush.msra.mxu2 %v283_v14 }
  0x25   : > { %347 = vmatpush.msra.mxu0 %v281_v16  ;;  %471 = vmatpush.msra.mxu3 %v284_v15 }
  0x26   : > { %869 = vmatmul.msk.f32.vlgmr.msra.gmra.mxu0 %vm328_vm1, %v326_v17  ;;  %367 = vmatpush.msra.mxu1 %v282_v18 }
  0x27   : > { %870 = vmatmul.msk.f32.vlgmr.msra.gmra.mxu1 %vm328_vm1, %v326_v17  ;;  %452 = vmatpush.msra.mxu2 %v281_v16 }
  0x28   : > { %472 = vmatpush.msra.mxu3 %v282_v18  ;;  %546 = vmatpush.msrb.mxu0 %v295_v1 }
  0x29   : > { %566 = vmatpush.msrb.mxu1 %v296_v3  ;;  %647 = vmatpush.msrb.mxu2 %v295_v1 }
  0x2a   : > { %547 = vmatpush.msrb.mxu0 %v293_v2  ;;  %667 = vmatpush.msrb.mxu3 %v296_v3 }
  0x2b   : > { %567 = vmatpush.msrb.mxu1 %v294_v5  ;;  %648 = vmatpush.msrb.mxu2 %v293_v2 }
  0x2c   : > { %548 = vmatpush.msrb.mxu0 %v291_v4  ;;  %668 = vmatpush.msrb.mxu3 %v294_v5 }
  0x2d   : > { %568 = vmatpush.msrb.mxu1 %v292_v6  ;;  %649 = vmatpush.msrb.mxu2 %v291_v4 }
  0x2e   : > { %549 = vmatpush.msrb.mxu0 %v289_v7  ;;  %669 = vmatpush.msrb.mxu3 %v292_v6 }
  0x2f   : > { %569 = vmatpush.msrb.mxu1 %v290_v8  ;;  %650 = vmatpush.msrb.mxu2 %v289_v7  ;;  %v477_v7 = vld [vmem:[%s1014_s29 + $0x10] sm:$0xff] }
  0x30   : > { %550 = vmatpush.msrb.mxu0 %v287_v10  ;;  %670 = vmatpush.msrb.mxu3 %v290_v8  ;;  %v479_v8 = vld [vmem:[%s1019_s9 + $0x20] sm:$0xff] }
  0x31   : > { %570 = vmatpush.msrb.mxu1 %v288_v11  ;;  %651 = vmatpush.msrb.mxu2 %v287_v10  ;;  %v481_v9 = vsel %vm1075_vm2, %v477_v7, %v479_v8 }
  0x32   : > { %551 = vmatpush.msrb.mxu0 %v285_v12  ;;  %671 = vmatpush.msrb.mxu3 %v288_v11 }
  0x33   : > { %571 = vmatpush.msrb.mxu1 %v286_v13  ;;  %652 = vmatpush.msrb.mxu2 %v285_v12 }
  0x34   : > { %552 = vmatpush.msrb.mxu0 %v283_v14  ;;  %672 = vmatpush.msrb.mxu3 %v286_v13 }
  0x35   : > { %572 = vmatpush.msrb.mxu1 %v284_v15  ;;  %653 = vmatpush.msrb.mxu2 %v283_v14 }
  0x36   : > { %553 = vmatpush.msrb.mxu0 %v281_v16  ;;  %673 = vmatpush.msrb.mxu3 %v284_v15  ;;  %v478_v15 = vld [vmem:[%s1014_s29 + $0x18] sm:$0xff] }
  0x37   : > { %573 = vmatpush.msrb.mxu1 %v282_v18  ;;  %654 = vmatpush.msrb.mxu2 %v281_v16  ;;  %v480_v16 = vld [vmem:[%s1019_s9 + $0x28] sm:$0xff] }
  0x38   : > { %674 = vmatpush.msrb.mxu3 %v282_v18  ;;  %v482_v18 = vsel %vm1083_vm3, %v478_v15, %v480_v16 }
  0x8f   : > { %v421_v56 = vpop.permute.xlu0 %420 }
  0xa3   : > { %v349_v26 = vpop.f32.mrf.mxu0 }
  0xa4   : > { %v378_v27 = vadd.f32 %v376_v25, %v349_v26  ;;  %v369_v36 = vpop.f32.mrf.mxu1 }
  0xa5   : > { %v379_v39 = vadd.f32 %v377_v37, %v369_v36 }
  0xa6   : > { %v871_v28 = vmul.f32 -1.442695, %v378_v27 }
  0xa7   : > { %v872_v51 = vmul.f32 -1.442695, %v379_v39 }
  0xa8   : > { %904 = vpow2.f32 %v871_v28 }
  0xae   : > { %v905_v31 = vpop.eup %904 }
  0xaf   : > { %v383_v32 = vadd.f32 1.0, %v905_v31 }
  0xb1   : > { %906 = vrcp.f32 %v383_v32  ;;  %v395_v42 = vand.u32 2147483648, %v383_v32  ;;  %v393_v44 = vand.u32 2147483647, %v383_v32  ;;  %vm389_vm5 = vweird.f32 %v383_v32 }
  0xb2   : > { %908 = vtanh.f32 %v379_v39 }
  0xb3   : > { %v396_v47 = vor.u32 1.1754944e-38, %v395_v42  ;;  %vm394_vm7 = vcmp.eq.f32.partialorder %v393_v44, 8.507059e+37  ;;  %910 = vpow2.f32 %v872_v51 }
  0xb7   : > { %v907_v38 = vpop.eup %906 }
  0xb8   : > { %v385_v40 = vmul.f32 %v907_v38, %v383_v32  ;;  %vm390_vm4 = vweird.f32 %v907_v38  ;;  %v909_v46 = vpop.eup %908 }
  0xb9   : > { %vm391_vm6 = vmor %vm389_vm5, %vm390_vm4  ;;  %v911_v52 = vpop.eup %910 }
  0xba   : > { %v386_v41 = vsub.f32 1.0, %v385_v40  ;;  %v403_v53 = vadd.f32 1.0, %v911_v52 }
  0xbc   : > { %v387_v43 = vmul.f32 %v907_v38, %v386_v41  ;;  %912 = vrcp.f32 %v403_v53  ;;  %vm409_vm8 = vweird.f32 %v403_v53  ;;  %v415_v62 = vand.u32 2147483648, %v403_v53 }
  0xbd   : > { %v413_v0 = vand.u32 2147483647, %v403_v53 }
  0xbe   : > { %v388_v45 = vadd.f32 %v907_v38, %v387_v43  ;;  %v416_v1 = vor.u32 1.1754944e-38, %v415_v62  ;;  %v581_v62 = vld [vmem:[%s1019_s9 + $0x18] sm:$0xff] }
  0xbf   : > { %vm414_vm11 = vcmp.eq.f32.partialorder %v413_v0, 8.507059e+37 }
  0xc0   : > { %v392_v48 = vsel %vm391_vm6, %v907_v38, %v388_v45 }
  0xc1   : > { %v397_v49 = vsel %vm394_vm7, %v396_v47, %v392_v48 }
  0xc2   : > { %v424_v50 = vmul.f32 %v909_v46, %v397_v49  ;;  %v913_v54 = vpop.eup %912  ;;  %v423_v59 = vmul.f32 %v421_v56, %v397_v49 }
  0xc3   : > { %v405_v55 = vmul.f32 %v913_v54, %v403_v53  ;;  %vm410_vm9 = vweird.f32 %v913_v54  ;;  %v578_v53 = vld [vmem:[%s1014_s29 + $0x20] sm:$0xff] }
  0xc4   : > { %426 = vrot.lane.b32.xlu0 %v424_v50, %s962_s7  ;;  %vm411_vm10 = vmor %vm409_vm8, %vm410_vm9 }
  0xc5   : > { %v406_v57 = vsub.f32 1.0, %v405_v55 }
  0xc7   : > { %v407_v58 = vmul.f32 %v913_v54, %v406_v57 }
  0xc9   : > { %v408_v63 = vadd.f32 %v913_v54, %v407_v58 }
  0xcb   : > { %v412_v2 = vsel %vm411_vm10, %v913_v54, %v408_v63  ;;  %v580_v54 = vld [vmem:[%s1019_s9 + $0x10] sm:$0xff] }
  0xcc   : > { %v417_v4 = vsel %vm414_vm11, %v416_v1, %v412_v2  ;;  %v582_v55 = vsel %vm1075_vm2, %v578_v53, %v580_v54 }
 0x136   : > { %v427_v60 = vpop.permute.xlu0 %426 }
 0x137   : > { %v429_v61 = vadd.f32 %v427_v60, %v423_v59 }
 0x139   : > { %914 = vtanh.f32 %v429_v61 }
 0x13f   : > { %v915_v3 = vpop.eup %914 }
 0x140   : > { %v1092_v5 = vmul.f32 %v915_v3, %v417_v4 }
 0x142   : > { %433 = vrot.lane.b32.xlu1 %v1092_v5, %s962_s7 }
 0x1b4   : > { %v434_v6 = vpop.permute.xlu1 %433 }
 0x1b5   : > { %873 = vmatmul.msk.f32.vlgmr.msra.gmra.mxu2 %vm328_vm1, %v434_v6  ;;  %874 = vmatmul.msk.f32.vlgmr.msra.gmra.mxu3 %vm328_vm1, %v434_v6 }
 0x238   : > { %v454_v10 = vpop.f32.mrf.mxu2  ;;  %v474_v17 = vpop.f32.mrf.mxu3 }
 0x239   : > { %v483_v11 = vadd.f32 %v481_v9, %v454_v10  ;;  %v484_v20 = vadd.f32 %v482_v18, %v474_v17 }
 0x23b   : > { %v875_v12 = vmul.f32 -1.442695, %v483_v11  ;;  %v876_v34 = vmul.f32 -1.442695, %v484_v20 }
 0x23d   : > { %916 = vpow2.f32 %v875_v12 }
 0x243   : > { %v917_v13 = vpop.eup %916 }
 0x244   : > { %v488_v14 = vadd.f32 1.0, %v917_v13 }
 0x246   : > { %918 = vrcp.f32 %v488_v14  ;;  %v500_v24 = vand.u32 2147483648, %v488_v14  ;;  %v498_v26 = vand.u32 2147483647, %v488_v14  ;;  %vm494_vm13 = vweird.f32 %v488_v14 }
 0x247   : > { %920 = vtanh.f32 %v484_v20 }
 0x248   : > { %v501_v28 = vor.u32 1.1754944e-38, %v500_v24  ;;  %vm499_vm15 = vcmp.eq.f32.partialorder %v498_v26, 8.507059e+37  ;;  %922 = vpow2.f32 %v876_v34 }
 0x24c   : > { %v919_v19 = vpop.eup %918 }
 0x24d   : > { %v490_v21 = vmul.f32 %v919_v19, %v488_v14  ;;  %vm495_vm12 = vweird.f32 %v919_v19  ;;  %v921_v30 = vpop.eup %920 }
 0x24e   : > { %vm496_vm14 = vmor %vm494_vm13, %vm495_vm12  ;;  %v923_v35 = vpop.eup %922 }
 0x24f   : > { %v491_v23 = vsub.f32 1.0, %v490_v21  ;;  %v508_v36 = vadd.f32 1.0, %v923_v35 }
 0x251   : > { %v492_v25 = vmul.f32 %v919_v19, %v491_v23  ;;  %924 = vrcp.f32 %v508_v36  ;;  %v520_v45 = vand.u32 2147483648, %v508_v36  ;;  %vm514_vm4 = vweird.f32 %v508_v36 }
 0x252   : > { %v518_v46 = vand.u32 2147483647, %v508_v36 }
 0x253   : > { %v493_v27 = vadd.f32 %v919_v19, %v492_v25  ;;  %v521_v48 = vor.u32 1.1754944e-38, %v520_v45  ;;  %v682_v45 = vld [vmem:[%s1019_s9 + $0x8] sm:$0xff] }
 0x254   : > { %vm519_vm6 = vcmp.eq.f32.partialorder %v518_v46, 8.507059e+37 }
 0x255   : > { %v497_v29 = vsel %vm496_vm14, %v919_v19, %v493_v27 }
 0x256   : > { %v502_v31 = vsel %vm499_vm15, %v501_v28, %v497_v29 }
 0x257   : > { %v525_v32 = vmul.f32 %v921_v30, %v502_v31  ;;  %v925_v37 = vpop.eup %924  ;;  %v524_v41 = vmul.f32 %v502_v31, %v429_v61  ;;  %v579_v61 = vld [vmem:[%s1014_s29 + $0x28] sm:$0xff] }
 0x258   : > { %v510_v38 = vmul.f32 %v925_v37, %v508_v36  ;;  %vm515_vm0 = vweird.f32 %v925_v37  ;;  %v583_v0 = vsel %vm1083_vm3, %v579_v61, %v581_v62  ;;  %v679_v36 = vld [vmem:[%s1014_s29 + $0x30] sm:$0xff] }
 0x259   : > { %527 = vrot.lane.b32.xlu1 %v525_v32, %s962_s7  ;;  %vm516_vm5 = vmor %vm514_vm4, %vm515_vm0 }
 0x25a   : > { %v511_v39 = vsub.f32 1.0, %v510_v38 }
 0x25c   : > { %v512_v40 = vmul.f32 %v925_v37, %v511_v39 }
 0x25e   : > { %v513_v44 = vadd.f32 %v925_v37, %v512_v40 }
 0x260   : > { %v517_v47 = vsel %vm516_vm5, %v925_v37, %v513_v44  ;;  %v681_v37 = vld [vmem:[%s1019_s9] sm:$0xff]  ;;  %v680_v44 = vld [vmem:[%s1014_s29 + $0x38] sm:$0xff] }
 0x261   : > { %v522_v50 = vsel %vm519_vm6, %v521_v48, %v517_v47  ;;  %v683_v38 = vsel %vm1075_vm2, %v679_v36, %v681_v37  ;;  %v684_v47 = vsel %vm1083_vm3, %v680_v44, %v682_v45 }
 0x2cb   : > { %v528_v42 = vpop.permute.xlu1 %527 }
 0x2cc   : > { %v530_v43 = vadd.f32 %v528_v42, %v524_v41 }
 0x2ce   : > { %926 = vtanh.f32 %v530_v43 }
 0x2d4   : > { %v927_v49 = vpop.eup %926 }
 0x2d5   : > { %v532_v51 = vmul.f32 %v927_v49, %v522_v50 }
 0x2d7   : > { %534 = vrot.lane.b32.xlu2 %v532_v51, %s962_s7 }
 0x331   : > { %v535_v52 = vpop.permute.xlu2 %534 }
 0x332   : > { %877 = vmatmul.msk.f32.vlgmr.msrb.gmra.mxu0 %vm328_vm1, %v535_v52  ;;  %878 = vmatmul.msk.f32.vlgmr.msrb.gmra.mxu1 %vm328_vm1, %v535_v52 }
 0x3af   : > { %v555_v56 = vpop.f32.mrf.mxu0  ;;  %v575_v63 = vpop.f32.mrf.mxu1 }
 0x3b0   : > { %v584_v57 = vadd.f32 %v582_v55, %v555_v56  ;;  %v585_v2 = vadd.f32 %v583_v0, %v575_v63 }
 0x3b2   : > { %v879_v58 = vmul.f32 -1.442695, %v584_v57  ;;  %v880_v15 = vmul.f32 -1.442695, %v585_v2 }
 0x3b4   : > { %928 = vpow2.f32 %v879_v58 }
 0x3ba   : > { %v929_v59 = vpop.eup %928 }
 0x3bb   : > { %v589_v60 = vadd.f32 1.0, %v929_v59 }
 0x3bd   : > { %930 = vrcp.f32 %v589_v60  ;;  %v601_v6 = vand.u32 2147483648, %v589_v60  ;;  %v599_v8 = vand.u32 2147483647, %v589_v60  ;;  %vm595_vm8 = vweird.f32 %v589_v60 }
 0x3be   : > { %932 = vtanh.f32 %v585_v2 }
 0x3bf   : > { %v602_v10 = vor.u32 1.1754944e-38, %v601_v6  ;;  %vm600_vm10 = vcmp.eq.f32.partialorder %v599_v8, 8.507059e+37  ;;  %934 = vpow2.f32 %v880_v15 }
 0x3c3   : > { %v931_v1 = vpop.eup %930 }
 0x3c4   : > { %v591_v3 = vmul.f32 %v931_v1, %v589_v60  ;;  %vm596_vm7 = vweird.f32 %v931_v1  ;;  %v933_v12 = vpop.eup %932 }
 0x3c5   : > { %vm597_vm9 = vmor %vm595_vm8, %vm596_vm7  ;;  %v935_v16 = vpop.eup %934 }
 0x3c6   : > { %v592_v4 = vsub.f32 1.0, %v591_v3  ;;  %v609_v17 = vadd.f32 1.0, %v935_v16 }
 0x3c8   : > { %v593_v7 = vmul.f32 %v931_v1, %v592_v4  ;;  %936 = vrcp.f32 %v609_v17  ;;  %v621_v27 = vand.u32 2147483648, %v609_v17  ;;  %vm615_vm12 = vweird.f32 %v609_v17 }
 0x3c9   : > { %v619_v28 = vand.u32 2147483647, %v609_v17 }
 0x3ca   : > { %v594_v9 = vadd.f32 %v931_v1, %v593_v7  ;;  %v622_v30 = vor.u32 1.1754944e-38, %v621_v27 }
 0x3cb   : > { %vm620_vm14 = vcmp.eq.f32.partialorder %v619_v28, 8.507059e+37 }
 0x3cc   : > { %v598_v11 = vsel %vm597_vm9, %v931_v1, %v594_v9 }
 0x3cd   : > { %v603_v13 = vsel %vm600_vm10, %v602_v10, %v598_v11 }
 0x3ce   : > { %v626_v14 = vmul.f32 %v933_v12, %v603_v13  ;;  %v937_v18 = vpop.eup %936  ;;  %v625_v23 = vmul.f32 %v603_v13, %v530_v43 }
 0x3cf   : > { %v611_v19 = vmul.f32 %v937_v18, %v609_v17  ;;  %vm616_vm11 = vweird.f32 %v937_v18 }
 0x3d0   : > { %628 = vrot.lane.b32.xlu2 %v626_v14, %s962_s7  ;;  %vm617_vm13 = vmor %vm615_vm12, %vm616_vm11 }
 0x3d1   : > { %v612_v20 = vsub.f32 1.0, %v611_v19 }
 0x3d3   : > { %v613_v21 = vmul.f32 %v937_v18, %v612_v20 }
 0x3d5   : > { %v614_v26 = vadd.f32 %v937_v18, %v613_v21 }
 0x3d7   : > { %v618_v29 = vsel %vm617_vm13, %v937_v18, %v614_v26 }
 0x3d8   : > { %v623_v32 = vsel %vm620_vm14, %v622_v30, %v618_v29 }
 0x42a   : > { %v629_v24 = vpop.permute.xlu2 %628 }
 0x42b   : > { %v631_v25 = vadd.f32 %v629_v24, %v625_v23 }
 0x42d   : > { %938 = vtanh.f32 %v631_v25 }
 0x433   : > { %v939_v31 = vpop.eup %938 }
 0x434   : > { %v633_v34 = vmul.f32 %v939_v31, %v623_v32 }
 0x436   : > { %635 = vrot.lane.b32.xlu0 %v633_v34, %s962_s7 }
 0x4a8   : > { %v636_v35 = vpop.permute.xlu0 %635 }
 0x4a9   : > { %881 = vmatmul.msk.f32.vlgmr.msrb.gmra.mxu2 %vm328_vm1, %v636_v35  ;;  %882 = vmatmul.msk.f32.vlgmr.msrb.gmra.mxu3 %vm328_vm1, %v636_v35 }
 0x52c   : > { %v656_v39 = vpop.f32.mrf.mxu2  ;;  %v676_v46 = vpop.f32.mrf.mxu3 }
 0x52d   : > { %v685_v40 = vadd.f32 %v683_v38, %v656_v39  ;;  %v686_v49 = vadd.f32 %v684_v47, %v676_v46 }
 0x52f   : > { %v883_v41 = vmul.f32 -1.442695, %v685_v40  ;;  %v884_v33 = vmul.f32 -1.442695, %v686_v49 }
 0x531   : > { %940 = vpow2.f32 %v883_v41 }
 0x537   : > { %v941_v42 = vpop.eup %940 }
 0x538   : > { %v690_v43 = vadd.f32 1.0, %v941_v42 }
 0x53a   : > { %942 = vrcp.f32 %v690_v43  ;;  %v702_v22 = vand.u32 2147483648, %v690_v43  ;;  %v700_v53 = vand.u32 2147483647, %v690_v43  ;;  %vm696_vm15 = vweird.f32 %v690_v43 }
 0x53b   : > { %944 = vtanh.f32 %v686_v49 }
 0x53c   : > { %v703_v55 = vor.u32 1.1754944e-38, %v702_v22  ;;  %vm701_vm4 = vcmp.eq.f32.partialorder %v700_v53, 8.507059e+37  ;;  %946 = vpow2.f32 %v884_v33 }
 0x540   : > { %v943_v48 = vpop.eup %942 }
 0x541   : > { %v692_v50 = vmul.f32 %v943_v48, %v690_v43  ;;  %vm697_vm2 = vweird.f32 %v943_v48  ;;  %v945_v57 = vpop.eup %944 }
 0x542   : > { %vm698_vm0 = vmor %vm696_vm15, %vm697_vm2  ;;  %v947_v60 = vpop.eup %946 }
 0x543   : > { %v693_v51 = vsub.f32 1.0, %v692_v50  ;;  %v710_v61 = vadd.f32 1.0, %v947_v60 }
 0x545   : > { %v694_v52 = vmul.f32 %v943_v48, %v693_v51  ;;  %948 = vrcp.f32 %v710_v61  ;;  %v722_v7 = vand.u32 2147483648, %v710_v61  ;;  %vm716_vm5 = vweird.f32 %v710_v61 }
 0x546   : > { %v720_v8 = vand.u32 2147483647, %v710_v61 }
 0x547   : > { %v695_v54 = vadd.f32 %v943_v48, %v694_v52  ;;  %v723_v10 = vor.u32 1.1754944e-38, %v722_v7 }
 0x548   : > { %vm721_vm7 = vcmp.eq.f32.partialorder %v720_v8, 8.507059e+37 }
 0x549   : > { %v699_v56 = vsel %vm698_vm0, %v943_v48, %v695_v54 }
 0x54a   : > { %v704_v58 = vsel %vm701_vm4, %v703_v55, %v699_v56 }
 0x54b   : > { %v727_v59 = vmul.f32 %v945_v57, %v704_v58  ;;  %v949_v62 = vpop.eup %948  ;;  %v726_v2 = vmul.f32 %v704_v58, %v631_v25 }
 0x54c   : > { %v712_v63 = vmul.f32 %v949_v62, %v710_v61  ;;  %vm717_vm3 = vweird.f32 %v949_v62 }
 0x54d   : > { %729 = vrot.lane.b32.xlu1 %v727_v59, %s962_s7  ;;  %vm718_vm6 = vmor %vm716_vm5, %vm717_vm3 }
 0x54e   : > { %v713_v0 = vsub.f32 1.0, %v712_v63 }
 0x550   : > { %v714_v1 = vmul.f32 %v949_v62, %v713_v0 }
 0x552   : > { %v715_v6 = vadd.f32 %v949_v62, %v714_v1 }
 0x554   : > { %v719_v9 = vsel %vm718_vm6, %v949_v62, %v715_v6 }
 0x555   : > { %v724_v12 = vsel %vm721_vm7, %v723_v10, %v719_v9 }
 0x5bf   : > { %v730_v3 = vpop.permute.xlu1 %729 }
 0x5c0   : > { %v732_v4 = vadd.f32 %v730_v3, %v726_v2 }
 0x5c2   : > { %950 = vtanh.f32 %v732_v4  ;;  %741 = vrot.lane.b32.xlu0 %v732_v4, %s962_s7 }
 0x5c8   : > { %v951_v11 = vpop.eup %950 }
 0x5c9   : > { %v734_v13 = vmul.f32 %v951_v11, %v724_v12 }
 0x5cb   : > { %736 = vrot.lane.b32.xlu2 %v734_v13, %s962_s7 }
 0x625   : > { %v737_v14 = vpop.permute.xlu2 %736 }
 0x626   : > { %739 = vst.msk [vmem:[#allocation2] sm:$0xff] %vm328_vm1, %v737_v14 }
 0x631   : > { %747 = sbr.rel (%p868_p5) target bundleno = 1834 (0x72a), region = 52 }
 0x634   : > { %v742_v15 = vpop.permute.xlu0 %741 }
 0x635   : > { %744 = vst.msk [vmem:[#allocation3] sm:$0xff] %vm328_vm1, %v742_v15 }
 0x636   : > { %v751_v16 = vld [vmem:[%s1182_s4 + $0x18] sm:$0xff]  ;;  %v750_v17 = vld [vmem:[%s1182_s4 + $0x10] sm:$0xff]  ;;  %756 = vrot.lane.b32.xlu0 %v1092_v5, %s963_s27  ;;  %v749_v18 = vld [vmem:[%s1182_s4 + $0x8] sm:$0xff]  ;;  %vm758_vm1 = vcmask 261120   ;;  %vm781_vm8 = vcmask 39936  }
 0x637   : > { %773 = vmatpush.msra.mxu0 %v751_v16  ;;  %v748_v19 = vld [vmem:[%s1182_s4] sm:$0xff] }
 0x638   : > { %v952_v21 = vld [vmem:[%s1183_s5] ss:$0 sm:$0xff] }
 0x639   : > { %774 = vmatpush.msra.mxu0 %v750_v17 }
 0x63b   : > { %775 = vmatpush.msra.mxu0 %v749_v18 }
 0x63d   : > { %776 = vmatpush.msra.mxu0 %v748_v19 }
 0x6a8   : > { %v757_v20 = vpop.permute.xlu0 %756 }
 0x6a9   : > { %886 = vmatmul.msk.f32.vlgmr.msra.gmra.mxu0 %vm758_vm1, %v757_v20 }
 0x726   : > { %v778_v5 = vpop.f32.mrf.mxu0 }
 0x727   : > { %v779_v23 = vadd.f32 %v952_v21, %v778_v5 }
 0x729   : > { %782 = vst.msk [vmem:[%s1184_s6] sm:$0xff] %vm781_vm8, %v779_v23 }
 0x72a PF: > { %p887_p6 = scmp.ne.s32.totalorder %s1005_s22, 1 }
 0x72c   : > { %786 = sbr.rel (%p887_p6) target bundleno = 1978 (0x7ba), region = 56 }
 0x731   : > { %v791_v24 = vld [vmem:[%s1181_s3 + $0x18] sm:$0xff]  ;;  %v790_v25 = vld [vmem:[%s1181_s3 + $0x10] sm:$0xff]  ;;  %v789_v26 = vld [vmem:[%s1181_s3 + $0x8] sm:$0xff]  ;;  %vm792_vm9 = vcmask 261120   ;;  %vm816_vm10 = vcmask 39936  }
 0x732   : > { %807 = vmatpush.msra.mxu0 %v791_v24  ;;  %v788_v27 = vld [vmem:[%s1181_s3] sm:$0xff] }
 0x733   : > { %v787_v28 = vld [vmem:[%s1184_s6] sm:$0xff] }
 0x734   : > { %808 = vmatpush.msra.mxu0 %v790_v25 }
 0x736   : > { %809 = vmatpush.msra.mxu0 %v789_v26 }
 0x738   : > { %810 = vmatpush.msra.mxu0 %v788_v27 }
 0x739   : > { %888 = vmatmul.msk.f32.vlgmr.msra.gmra.mxu0 %vm792_vm9, %v737_v14 }
 0x7b6   : > { %v812_v29 = vpop.f32.mrf.mxu0 }
 0x7b7   : > { %v815_v30 = vadd.f32 %v812_v29, %v787_v28 }
 0x7b9   : > { %817 = vst.msk [vmem:[%s1184_s6] sm:$0xff] %vm816_vm10, %v815_v30 }
 0x7ba PF: > { %s16_s21 = sadd.s32 1, %s959_s21  }
 0x7bb   : > { %p13_p7 = scmp.ge.s32.totalorder %s16_s21, 4  }
 0x7bd   :  { %15 = sbr.rel (!%p13_p7) target bundleno = 1 (0x1), region = 85 }

</bundles_post_ra>
